<compile_context>
chip_gen: v5e
topology: v5e:2x2
jax: 0.10.0
libtpu: 0.0.40
codegen_flags: <defaults>
</compile_context>

<pallas_src>
import functools

import numpy as np
import jax
import jax.numpy as jnp
from jax.experimental import pallas as pl
from jax.experimental.pallas import tpu as pltpu


def _layernorm(x, w, b, eps):
    mu = jnp.mean(x, axis=-1, keepdims=True)
    var = jnp.mean(jnp.square(x - mu), axis=-1, keepdims=True)
    return (x - mu) * jax.lax.rsqrt(var + eps) * w + b


def _gelu_tanh(x):
    c = 0.7978845608028654  # sqrt(2/pi)
    return 0.5 * x * (1.0 + jnp.tanh(c * (x + 0.044715 * x * x * x)))


def _block1_kernel(x_ref, n1w_ref, n1b_ref, wqkv_ref, tw_ref, wproj_ref, bproj_ref,
                   n2w_ref, n2b_ref, w1_ref, b1_ref, w2_ref, b2_ref, o_ref,
                   *, num_heads, scale, eps):
    x = x_ref[0].astype(jnp.float32)                     # (N, C): one batch element
    N, C = x.shape
    H = num_heads
    Dh = C // H
    Ch = C // 2

    # ---------------- attention branch ----------------
    xn = _layernorm(x, n1w_ref[...], n1b_ref[...], eps)  # norm1, (N, C)

    # time_shift on the first C/2 channels: token i <- token i-1, token 0 <- 0.
    # Built as a tiny in-kernel shift operator (iota compare) -> one (N,N)x(N,C) MXU matmul.
    r = jax.lax.broadcasted_iota(jnp.int32, (N, N), 0)
    c = jax.lax.broadcasted_iota(jnp.int32, (N, N), 1)
    shift_mat = jnp.where(r == c + 1, 1.0, 0.0).astype(jnp.float32)
    xn_shift = jnp.dot(shift_mat, xn, preferred_element_type=jnp.float32)
    col = jax.lax.broadcasted_iota(jnp.int32, (N, C), 1)
    x_att = jnp.where(col < Ch, xn_shift, xn)            # (N, C)

    # fused QKV projection (qkv_bias=False): one lane-dense MXU matmul, K=C, N_out=3C.
    qkv = jnp.dot(x_att, wqkv_ref[...], preferred_element_type=jnp.float32)  # (N, 3C)

    head_outs = []
    for h in range(H):                                   # static unroll over heads
        qh = qkv[:, h * Dh:(h + 1) * Dh]
        kh = qkv[:, C + h * Dh:C + (h + 1) * Dh]
        vh = qkv[:, 2 * C + h * Dh:2 * C + (h + 1) * Dh]
        # q @ k^T without an explicit transpose (contract both last dims).
        s = jax.lax.dot_general(qh, kh, (((1,), (1,)), ((), ())),
                                preferred_element_type=jnp.float32) * scale  # (N, N)
        s = s - jnp.max(s, axis=-1, keepdims=True)
        p = jnp.exp(s)
        p = p / jnp.sum(p, axis=-1, keepdims=True)
        p = p * tw_ref[h]                                # time_weighting[h, :N, :N]
        head_outs.append(jnp.dot(p, vh, preferred_element_type=jnp.float32))
    attn = jnp.concatenate(head_outs, axis=-1)           # (N, C), lane-dense again

    attn = jnp.dot(attn, wproj_ref[...], preferred_element_type=jnp.float32) + bproj_ref[...]
    x1 = x + attn                                        # residual (drop_path / dropout = identity)

    # ---------------- MLP branch ----------------
    x2 = _layernorm(x1, n2w_ref[...], n2b_ref[...], eps)  # norm2
    h1 = jnp.dot(x2, w1_ref[...], preferred_element_type=jnp.float32) + b1_ref[...]
    h1 = _gelu_tanh(h1)
    y = jnp.dot(h1, w2_ref[...], preferred_element_type=jnp.float32) + b2_ref[...]

    o_ref[0] = (x1 + y).astype(o_ref.dtype)


def block1_forward(x, params, *, num_heads, qk_scale=1, eps=1e-5):
    """Fused Block1 forward.

    x: (B, N, C) float32.
    params (torch layout):
        norm1_w (C,), norm1_b (C,),
        qkv_w (3C, C),                      # nn.Linear(dim, 3*dim, bias=False).weight
        time_weighting (H, block, block),   # full parameter; sliced [:, :N, :N] here
        proj_w (C, C), proj_b (C,),
        norm2_w (C,), norm2_b (C,),
        fc1_w (Dff, C), fc1_b (Dff,), fc2_w (C, Dff), fc2_b (C,)
    Returns (B, N, C).
    """
    B, N, C = x.shape
    H = num_heads
    Dh = C // H
    scale = float(qk_scale) if qk_scale else float(Dh) ** -0.5

    (n1w, n1b, qkv_w, tw_full, proj_w, proj_b,
     n2w, n2b, fc1_w, fc1_b, fc2_w, fc2_b) = params

    # Wrapper-side layout plumbing (plain XLA, done once, outside the kernel).
    wqkv = jnp.asarray(qkv_w).T                   # (C, 3C)  input-major for x @ W
    wproj = jnp.asarray(proj_w).T                 # (C, C)
    w1 = jnp.asarray(fc1_w).T                     # (C, Dff)
    w2 = jnp.asarray(fc2_w).T                     # (Dff, C)
    Dff = w1.shape[1]
    tw = jnp.asarray(tw_full)[:, :N, :N]          # (H, N, N)
    n1w2 = jnp.reshape(jnp.asarray(n1w), (1, C))
    n1b2 = jnp.reshape(jnp.asarray(n1b), (1, C))
    n2w2 = jnp.reshape(jnp.asarray(n2w), (1, C))
    n2b2 = jnp.reshape(jnp.asarray(n2b), (1, C))
    bproj = jnp.reshape(jnp.asarray(proj_b), (1, C))
    b1 = jnp.reshape(jnp.asarray(fc1_b), (1, Dff))
    b2 = jnp.reshape(jnp.asarray(fc2_b), (1, C))

    kernel = functools.partial(_block1_kernel, num_heads=H, scale=scale, eps=float(eps))

    const2 = lambda b: (0, 0)
    const3 = lambda b: (0, 0, 0)
    return pl.pallas_call(
        kernel,
        out_shape=jax.ShapeDtypeStruct((B, N, C), x.dtype),
        grid_spec=pltpu.PrefetchScalarGridSpec(
            num_scalar_prefetch=0,
            grid=(B,),
            in_specs=[
                pl.BlockSpec((1, N, C), lambda b: (b, 0, 0)),      # x (per batch element)
                pl.BlockSpec((1, C), const2),                       # norm1 weight
                pl.BlockSpec((1, C), const2),                       # norm1 bias
                pl.BlockSpec((C, 3 * C), const2),                   # qkv weight (in, out)
                pl.BlockSpec((H, N, N), const3),                    # time_weighting[:, :N, :N]
                pl.BlockSpec((C, C), const2),                       # proj weight (in, out)
                pl.BlockSpec((1, C), const2),                       # proj bias
                pl.BlockSpec((1, C), const2),                       # norm2 weight
                pl.BlockSpec((1, C), const2),                       # norm2 bias
                pl.BlockSpec((C, Dff), const2),                     # fc1 weight (in, out)
                pl.BlockSpec((1, Dff), const2),                     # fc1 bias
                pl.BlockSpec((Dff, C), const2),                     # fc2 weight (in, out)
                pl.BlockSpec((1, C), const2),                       # fc2 bias
            ],
            out_specs=pl.BlockSpec((1, N, C), lambda b: (b, 0, 0)),
        ),
        compiler_params=pltpu.CompilerParams(dimension_semantics=("parallel",)),
    )(x, n1w2, n1b2, wqkv, tw, wproj, bproj, n2w2, n2b2, w1, b1, w2, b2)


def _reference(x, params, num_heads, qk_scale, eps):
    """Pure numpy reference of Block1.forward (eval mode, tanh-GELU), torch-layout params."""
    (n1w, n1b, qkv_w, tw_full, proj_w, proj_b,
     n2w, n2b, fc1_w, fc1_b, fc2_w, fc2_b) = [np.asarray(p, np.float32) for p in params]
    x = np.asarray(x, np.float32)
    B, N, C = x.shape
    H = num_heads
    Dh = C // H
    Ch = C // 2
    scale = float(qk_scale) if qk_scale else float(Dh) ** -0.5
    tw = tw_full[:, :N, :N]

    def ln(v, w, b):
        mu = v.mean(-1, keepdims=True)
        var = ((v - mu) ** 2).mean(-1, keepdims=True)
        return (v - mu) / np.sqrt(var + eps) * w + b

    def gelu(v):
        cc = 0.7978845608028654
        return 0.5 * v * (1.0 + np.tanh(cc * (v + 0.044715 * v ** 3)))

    xn = ln(x, n1w, n1b)
    shifted = np.zeros_like(xn)
    shifted[:, 1:] = xn[:, :-1]
    x_att = np.concatenate([shifted[..., :Ch], xn[..., Ch:]], axis=-1)
    qkv = x_att @ qkv_w.T                                  # (B, N, 3C)
    attn_out = np.zeros((B, N, C), np.float32)
    for h in range(H):
        q = qkv[..., h * Dh:(h + 1) * Dh]
        k = qkv[..., C + h * Dh:C + (h + 1) * Dh]
        v = qkv[..., 2 * C + h * Dh:2 * C + (h + 1) * Dh]
        s = np.einsum('bqd,bkd->bqk', q, k) * scale
        s = s - s.max(-1, keepdims=True)
        p = np.exp(s)
        p = p / p.sum(-1, keepdims=True)
        p = p * tw[h]
        attn_out[..., h * Dh:(h + 1) * Dh] = np.einsum('bqk,bkd->bqd', p, v)
    attn_out = attn_out @ proj_w.T + proj_b
    x1 = x + attn_out
    x2 = ln(x1, n2w, n2b)
    h1 = gelu(x2 @ fc1_w.T + fc1_b)
    y = h1 @ fc2_w.T + fc2_b
    return x1 + y


if __name__ == "__main__":
    B, N, C, H = 2, 16, 128, 8            # dim=128 keeps all last dims lane-dense
    BLOCK = 128                            # Attention block_size (time_weighting extent)
    mlp_ratio = 2.0
    Dff = int(C * mlp_ratio)
    eps = 1e-5
    qk_scale = 1                           # Block1 passes qk_scale=1

    key = jax.random.PRNGKey(0)
    ks = jax.random.split(key, 13)

    x = jax.random.normal(ks[0], (B, N, C), jnp.float32)

    # torch-layout parameters
    n1w = 1.0 + 0.1 * jax.random.normal(ks[1], (C,), jnp.float32)
    n1b = 0.1 * jax.random.normal(ks[2], (C,), jnp.float32)
    qkv_w = jax.random.normal(ks[3], (3 * C, C), jnp.float32) / np.sqrt(C)
    tw_full = 1.0 + 0.1 * jax.random.normal(ks[4], (H, BLOCK, BLOCK), jnp.float32)
    proj_w = jax.random.normal(ks[5], (C, C), jnp.float32) / np.sqrt(C)
    proj_b = 0.02 * jax.random.normal(ks[6], (C,), jnp.float32)
    n2w = 1.0 + 0.1 * jax.random.normal(ks[7], (C,), jnp.float32)
    n2b = 0.1 * jax.random.normal(ks[8], (C,), jnp.float32)
    fc1_w = jax.random.normal(ks[9], (Dff, C), jnp.float32) / np.sqrt(C)
    fc1_b = 0.02 * jax.random.normal(ks[10], (Dff,), jnp.float32)
    fc2_w = jax.random.normal(ks[11], (C, Dff), jnp.float32) / np.sqrt(Dff)
    fc2_b = 0.02 * jax.random.normal(ks[12], (C,), jnp.float32)

    params = (n1w, n1b, qkv_w, tw_full, proj_w, proj_b,
              n2w, n2b, fc1_w, fc1_b, fc2_w, fc2_b)

    y = block1_forward(x, params, num_heads=H, qk_scale=qk_scale, eps=eps)
    y = jax.block_until_ready(y)

    y_ref = _reference(x, params, num_heads=H, qk_scale=qk_scale, eps=eps)
    assert y.shape == y_ref.shape, (y.shape, y_ref.shape)
    np.testing.assert_allclose(np.asarray(y), y_ref, rtol=5e-4, atol=5e-4)

    print("KERNEL_OK")
</pallas_src>

<mosaic_0001>
module attributes {stable_mosaic.version = 11 : i64} {
  func.func @_block1_kernel(%arg0: i32, %arg1: memref<1x16x128xf32, #tpu.memory_space<vmem>>, %arg2: memref<1x128xf32, #tpu.memory_space<vmem>>, %arg3: memref<1x128xf32, #tpu.memory_space<vmem>>, %arg4: memref<128x384xf32, #tpu.memory_space<vmem>>, %arg5: memref<8x16x16xf32, #tpu.memory_space<vmem>>, %arg6: memref<128x128xf32, #tpu.memory_space<vmem>>, %arg7: memref<1x128xf32, #tpu.memory_space<vmem>>, %arg8: memref<1x128xf32, #tpu.memory_space<vmem>>, %arg9: memref<1x128xf32, #tpu.memory_space<vmem>>, %arg10: memref<128x256xf32, #tpu.memory_space<vmem>>, %arg11: memref<1x256xf32, #tpu.memory_space<vmem>>, %arg12: memref<256x128xf32, #tpu.memory_space<vmem>>, %arg13: memref<1x128xf32, #tpu.memory_space<vmem>>, %arg14: memref<1x16x128xf32, #tpu.memory_space<vmem>>) attributes {dimension_semantics = [#tpu.dimension_semantics<parallel>], iteration_bounds = array<i64: 2>, scalar_prefetch = 0 : i64, scratch_operands = 0 : i64, tpu.core_type = #tpu.core_type<tc>, window_params = [{transform_indices = @transform_0, window_bounds = array<i64: 1, 16, 128>}, {pipeline_mode = #tpu.pipeline_mode<synchronous>, transform_indices = @transform_1, window_bounds = array<i64: 1, 128>}, {pipeline_mode = #tpu.pipeline_mode<synchronous>, transform_indices = @transform_2, window_bounds = array<i64: 1, 128>}, {pipeline_mode = #tpu.pipeline_mode<synchronous>, transform_indices = @transform_3, window_bounds = array<i64: 128, 384>}, {pipeline_mode = #tpu.pipeline_mode<synchronous>, transform_indices = @transform_4, window_bounds = array<i64: 8, 16, 16>}, {pipeline_mode = #tpu.pipeline_mode<synchronous>, transform_indices = @transform_5, window_bounds = array<i64: 128, 128>}, {pipeline_mode = #tpu.pipeline_mode<synchronous>, transform_indices = @transform_6, window_bounds = array<i64: 1, 128>}, {pipeline_mode = #tpu.pipeline_mode<synchronous>, transform_indices = @transform_7, window_bounds = array<i64: 1, 128>}, {pipeline_mode = #tpu.pipeline_mode<synchronous>, transform_indices = @transform_8, window_bounds = array<i64: 1, 128>}, {pipeline_mode = #tpu.pipeline_mode<synchronous>, transform_indices = @transform_9, window_bounds = array<i64: 128, 256>}, {pipeline_mode = #tpu.pipeline_mode<synchronous>, transform_indices = @transform_10, window_bounds = array<i64: 1, 256>}, {pipeline_mode = #tpu.pipeline_mode<synchronous>, transform_indices = @transform_11, window_bounds = array<i64: 256, 128>}, {pipeline_mode = #tpu.pipeline_mode<synchronous>, transform_indices = @transform_12, window_bounds = array<i64: 1, 128>}, {transform_indices = @transform_13, window_bounds = array<i64: 1, 16, 128>}]} {
    %c0 = arith.constant 0 : index
    %c0_0 = arith.constant 0 : index
    %c0_1 = arith.constant 0 : index
    %0 = vector.load %arg1[%c0, %c0_0, %c0_1] : memref<1x16x128xf32, #tpu.memory_space<vmem>>, vector<1x16x128xf32>
    %1 = vector.shape_cast %0 : vector<1x16x128xf32> to vector<16x128xf32>
    %c0_2 = arith.constant 0 : index
    %c0_3 = arith.constant 0 : index
    %2 = vector.load %arg2[%c0_2, %c0_3] : memref<1x128xf32, #tpu.memory_space<vmem>>, vector<1x128xf32>
    %c0_4 = arith.constant 0 : index
    %c0_5 = arith.constant 0 : index
    %3 = vector.load %arg3[%c0_4, %c0_5] : memref<1x128xf32, #tpu.memory_space<vmem>>, vector<1x128xf32>
    %cst = arith.constant dense<0.000000e+00> : vector<16xf32>
    %4 = vector.multi_reduction <add>, %1, %cst [1] : vector<16x128xf32> to vector<16xf32>
    %5 = vector.shape_cast %4 : vector<16xf32> to vector<16x1xf32>
    %cst_6 = arith.constant 1.280000e+02 : f32
    %6 = vector.broadcast %cst_6 : f32 to vector<16x1xf32>
    %7 = arith.divf %5, %6 : vector<16x1xf32>
    %8 = vector.broadcast %7 : vector<16x1xf32> to vector<16x128xf32>
    %9 = arith.subf %1, %8 : vector<16x128xf32>
    %10 = arith.mulf %9, %9 : vector<16x128xf32>
    %cst_7 = arith.constant dense<0.000000e+00> : vector<16xf32>
    %11 = vector.multi_reduction <add>, %10, %cst_7 [1] : vector<16x128xf32> to vector<16xf32>
    %12 = vector.shape_cast %11 : vector<16xf32> to vector<16x1xf32>
    %cst_8 = arith.constant 1.280000e+02 : f32
    %13 = vector.broadcast %cst_8 : f32 to vector<16x1xf32>
    %14 = arith.divf %12, %13 : vector<16x1xf32>
    %15 = vector.broadcast %7 : vector<16x1xf32> to vector<16x128xf32>
    %16 = arith.subf %1, %15 : vector<16x128xf32>
    %cst_9 = arith.constant 9.99999974E-6 : f32
    %17 = vector.broadcast %cst_9 : f32 to vector<16x1xf32>
    %18 = arith.addf %14, %17 : vector<16x1xf32>
    %19 = math.rsqrt %18 : vector<16x1xf32>
    %20 = vector.broadcast %19 : vector<16x1xf32> to vector<16x128xf32>
    %21 = arith.mulf %16, %20 : vector<16x128xf32>
    %22 = vector.broadcast %2 : vector<1x128xf32> to vector<16x128xf32>
    %23 = arith.mulf %21, %22 : vector<16x128xf32>
    %24 = vector.broadcast %3 : vector<1x128xf32> to vector<16x128xf32>
    %25 = arith.addf %23, %24 : vector<16x128xf32>
    %26 = tpu.iota {dimensions = array<i32: 0>} : vector<16x16xi32>
    %27 = tpu.iota {dimensions = array<i32: 1>} : vector<16x16xi32>
    %c1_i32 = arith.constant 1 : i32
    %28 = vector.broadcast %c1_i32 : i32 to vector<16x16xi32>
    %29 = arith.addi %27, %28 : vector<16x16xi32>
    %30 = arith.cmpi eq, %26, %29 : vector<16x16xi32>
    %cst_10 = arith.constant 1.000000e+00 : f32
    %cst_11 = arith.constant 0.000000e+00 : f32
    %31 = vector.broadcast %cst_10 : f32 to vector<16x16xf32>
    %32 = vector.broadcast %cst_11 : f32 to vector<16x16xf32>
    %33 = arith.select %30, %31, %32 : vector<16x16xi1>, vector<16x16xf32>
    %cst_12 = arith.constant dense<0.000000e+00> : vector<16x128xf32>
    %34 = tpu.matmul %33, %25, %cst_12 {dimension_numbers = #tpu.dot_dimension_numbers<[1], [0], [0], [1], [0, 0, 1, 1], [], []>} : vector<16x16xf32>, vector<16x128xf32>, vector<16x128xf32> -> vector<16x128xf32>
    %35 = tpu.iota {dimensions = array<i32: 1>} : vector<16x128xi32>
    %c64_i32 = arith.constant 64 : i32
    %36 = vector.broadcast %c64_i32 : i32 to vector<16x128xi32>
    %37 = arith.cmpi slt, %35, %36 : vector<16x128xi32>
    %38 = arith.select %37, %34, %25 : vector<16x128xi1>, vector<16x128xf32>
    %c0_13 = arith.constant 0 : index
    %c0_14 = arith.constant 0 : index
    %39 = vector.load %arg4[%c0_13, %c0_14] : memref<128x384xf32, #tpu.memory_space<vmem>>, vector<128x384xf32>
    %cst_15 = arith.constant dense<0.000000e+00> : vector<16x384xf32>
    %40 = tpu.matmul %38, %39, %cst_15 {dimension_numbers = #tpu.dot_dimension_numbers<[1], [0], [0], [1], [0, 0, 1, 1], [], []>} : vector<16x128xf32>, vector<128x384xf32>, vector<16x384xf32> -> vector<16x384xf32>
    %41 = vector.extract_strided_slice %40 {offsets = [0, 0], sizes = [16, 16], strides = [1, 1]} : vector<16x384xf32> to vector<16x16xf32>
    %42 = vector.extract_strided_slice %40 {offsets = [0, 128], sizes = [16, 16], strides = [1, 1]} : vector<16x384xf32> to vector<16x16xf32>
    %43 = vector.extract_strided_slice %40 {offsets = [0, 256], sizes = [16, 16], strides = [1, 1]} : vector<16x384xf32> to vector<16x16xf32>
    %cst_16 = arith.constant dense<0.000000e+00> : vector<16x16xf32>
    %44 = tpu.matmul %41, %42, %cst_16 {dimension_numbers = #tpu.dot_dimension_numbers<[1], [1], [0], [0], [0, 0, 1, 0], [], []>} : vector<16x16xf32>, vector<16x16xf32>, vector<16x16xf32> -> vector<16x16xf32>
    %cst_17 = arith.constant 1.000000e+00 : f32
    %45 = vector.broadcast %cst_17 : f32 to vector<16x16xf32>
    %46 = arith.mulf %44, %45 : vector<16x16xf32>
    %cst_18 = arith.constant dense<0xFF800000> : vector<16xf32>
    %47 = vector.multi_reduction <maximumf>, %46, %cst_18 [1] : vector<16x16xf32> to vector<16xf32>
    %48 = vector.shape_cast %47 : vector<16xf32> to vector<16x1xf32>
    %49 = vector.broadcast %48 : vector<16x1xf32> to vector<16x16xf32>
    %50 = arith.subf %46, %49 : vector<16x16xf32>
    %51 = math.exp %50 : vector<16x16xf32>
    %cst_19 = arith.constant dense<0.000000e+00> : vector<16xf32>
    %52 = vector.multi_reduction <add>, %51, %cst_19 [1] : vector<16x16xf32> to vector<16xf32>
    %53 = vector.shape_cast %52 : vector<16xf32> to vector<16x1xf32>
    %54 = vector.broadcast %53 : vector<16x1xf32> to vector<16x16xf32>
    %55 = arith.divf %51, %54 : vector<16x16xf32>
    %c0_20 = arith.constant 0 : index
    %c0_21 = arith.constant 0 : index
    %c0_22 = arith.constant 0 : index
    %56 = vector.load %arg5[%c0_20, %c0_21, %c0_22] : memref<8x16x16xf32, #tpu.memory_space<vmem>>, vector<1x16x16xf32>
    %57 = vector.shape_cast %56 : vector<1x16x16xf32> to vector<16x16xf32>
    %58 = arith.mulf %55, %57 : vector<16x16xf32>
    %cst_23 = arith.constant dense<0.000000e+00> : vector<16x16xf32>
    %59 = tpu.matmul %58, %43, %cst_23 {dimension_numbers = #tpu.dot_dimension_numbers<[1], [0], [0], [1], [0, 0, 1, 1], [], []>} : vector<16x16xf32>, vector<16x16xf32>, vector<16x16xf32> -> vector<16x16xf32>
    %60 = vector.extract_strided_slice %40 {offsets = [0, 16], sizes = [16, 16], strides = [1, 1]} : vector<16x384xf32> to vector<16x16xf32>
    %61 = vector.extract_strided_slice %40 {offsets = [0, 144], sizes = [16, 16], strides = [1, 1]} : vector<16x384xf32> to vector<16x16xf32>
    %62 = vector.extract_strided_slice %40 {offsets = [0, 272], sizes = [16, 16], strides = [1, 1]} : vector<16x384xf32> to vector<16x16xf32>
    %cst_24 = arith.constant dense<0.000000e+00> : vector<16x16xf32>
    %63 = tpu.matmul %60, %61, %cst_24 {dimension_numbers = #tpu.dot_dimension_numbers<[1], [1], [0], [0], [0, 0, 1, 0], [], []>} : vector<16x16xf32>, vector<16x16xf32>, vector<16x16xf32> -> vector<16x16xf32>
    %cst_25 = arith.constant 1.000000e+00 : f32
    %64 = vector.broadcast %cst_25 : f32 to vector<16x16xf32>
    %65 = arith.mulf %63, %64 : vector<16x16xf32>
    %cst_26 = arith.constant dense<0xFF800000> : vector<16xf32>
    %66 = vector.multi_reduction <maximumf>, %65, %cst_26 [1] : vector<16x16xf32> to vector<16xf32>
    %67 = vector.shape_cast %66 : vector<16xf32> to vector<16x1xf32>
    %68 = vector.broadcast %67 : vector<16x1xf32> to vector<16x16xf32>
    %69 = arith.subf %65, %68 : vector<16x16xf32>
    %70 = math.exp %69 : vector<16x16xf32>
    %cst_27 = arith.constant dense<0.000000e+00> : vector<16xf32>
    %71 = vector.multi_reduction <add>, %70, %cst_27 [1] : vector<16x16xf32> to vector<16xf32>
    %72 = vector.shape_cast %71 : vector<16xf32> to vector<16x1xf32>
    %73 = vector.broadcast %72 : vector<16x1xf32> to vector<16x16xf32>
    %74 = arith.divf %70, %73 : vector<16x16xf32>
    %c1 = arith.constant 1 : index
    %c0_28 = arith.constant 0 : index
    %c0_29 = arith.constant 0 : index
    %75 = vector.load %arg5[%c1, %c0_28, %c0_29] : memref<8x16x16xf32, #tpu.memory_space<vmem>>, vector<1x16x16xf32>
    %76 = vector.shape_cast %75 : vector<1x16x16xf32> to vector<16x16xf32>
    %77 = arith.mulf %74, %76 : vector<16x16xf32>
    %cst_30 = arith.constant dense<0.000000e+00> : vector<16x16xf32>
    %78 = tpu.matmul %77, %62, %cst_30 {dimension_numbers = #tpu.dot_dimension_numbers<[1], [0], [0], [1], [0, 0, 1, 1], [], []>} : vector<16x16xf32>, vector<16x16xf32>, vector<16x16xf32> -> vector<16x16xf32>
    %79 = vector.extract_strided_slice %40 {offsets = [0, 32], sizes = [16, 16], strides = [1, 1]} : vector<16x384xf32> to vector<16x16xf32>
    %80 = vector.extract_strided_slice %40 {offsets = [0, 160], sizes = [16, 16], strides = [1, 1]} : vector<16x384xf32> to vector<16x16xf32>
    %81 = vector.extract_strided_slice %40 {offsets = [0, 288], sizes = [16, 16], strides = [1, 1]} : vector<16x384xf32> to vector<16x16xf32>
    %cst_31 = arith.constant dense<0.000000e+00> : vector<16x16xf32>
    %82 = tpu.matmul %79, %80, %cst_31 {dimension_numbers = #tpu.dot_dimension_numbers<[1], [1], [0], [0], [0, 0, 1, 0], [], []>} : vector<16x16xf32>, vector<16x16xf32>, vector<16x16xf32> -> vector<16x16xf32>
    %cst_32 = arith.constant 1.000000e+00 : f32
    %83 = vector.broadcast %cst_32 : f32 to vector<16x16xf32>
    %84 = arith.mulf %82, %83 : vector<16x16xf32>
    %cst_33 = arith.constant dense<0xFF800000> : vector<16xf32>
    %85 = vector.multi_reduction <maximumf>, %84, %cst_33 [1] : vector<16x16xf32> to vector<16xf32>
    %86 = vector.shape_cast %85 : vector<16xf32> to vector<16x1xf32>
    %87 = vector.broadcast %86 : vector<16x1xf32> to vector<16x16xf32>
    %88 = arith.subf %84, %87 : vector<16x16xf32>
    %89 = math.exp %88 : vector<16x16xf32>
    %cst_34 = arith.constant dense<0.000000e+00> : vector<16xf32>
    %90 = vector.multi_reduction <add>, %89, %cst_34 [1] : vector<16x16xf32> to vector<16xf32>
    %91 = vector.shape_cast %90 : vector<16xf32> to vector<16x1xf32>
    %92 = vector.broadcast %91 : vector<16x1xf32> to vector<16x16xf32>
    %93 = arith.divf %89, %92 : vector<16x16xf32>
    %c2 = arith.constant 2 : index
    %c0_35 = arith.constant 0 : index
    %c0_36 = arith.constant 0 : index
    %94 = vector.load %arg5[%c2, %c0_35, %c0_36] : memref<8x16x16xf32, #tpu.memory_space<vmem>>, vector<1x16x16xf32>
    %95 = vector.shape_cast %94 : vector<1x16x16xf32> to vector<16x16xf32>
    %96 = arith.mulf %93, %95 : vector<16x16xf32>
    %cst_37 = arith.constant dense<0.000000e+00> : vector<16x16xf32>
    %97 = tpu.matmul %96, %81, %cst_37 {dimension_numbers = #tpu.dot_dimension_numbers<[1], [0], [0], [1], [0, 0, 1, 1], [], []>} : vector<16x16xf32>, vector<16x16xf32>, vector<16x16xf32> -> vector<16x16xf32>
    %98 = vector.extract_strided_slice %40 {offsets = [0, 48], sizes = [16, 16], strides = [1, 1]} : vector<16x384xf32> to vector<16x16xf32>
    %99 = vector.extract_strided_slice %40 {offsets = [0, 176], sizes = [16, 16], strides = [1, 1]} : vector<16x384xf32> to vector<16x16xf32>
    %100 = vector.extract_strided_slice %40 {offsets = [0, 304], sizes = [16, 16], strides = [1, 1]} : vector<16x384xf32> to vector<16x16xf32>
    %cst_38 = arith.constant dense<0.000000e+00> : vector<16x16xf32>
    %101 = tpu.matmul %98, %99, %cst_38 {dimension_numbers = #tpu.dot_dimension_numbers<[1], [1], [0], [0], [0, 0, 1, 0], [], []>} : vector<16x16xf32>, vector<16x16xf32>, vector<16x16xf32> -> vector<16x16xf32>
    %cst_39 = arith.constant 1.000000e+00 : f32
    %102 = vector.broadcast %cst_39 : f32 to vector<16x16xf32>
    %103 = arith.mulf %101, %102 : vector<16x16xf32>
    %cst_40 = arith.constant dense<0xFF800000> : vector<16xf32>
    %104 = vector.multi_reduction <maximumf>, %103, %cst_40 [1] : vector<16x16xf32> to vector<16xf32>
    %105 = vector.shape_cast %104 : vector<16xf32> to vector<16x1xf32>
    %106 = vector.broadcast %105 : vector<16x1xf32> to vector<16x16xf32>
    %107 = arith.subf %103, %106 : vector<16x16xf32>
    %108 = math.exp %107 : vector<16x16xf32>
    %cst_41 = arith.constant dense<0.000000e+00> : vector<16xf32>
    %109 = vector.multi_reduction <add>, %108, %cst_41 [1] : vector<16x16xf32> to vector<16xf32>
    %110 = vector.shape_cast %109 : vector<16xf32> to vector<16x1xf32>
    %111 = vector.broadcast %110 : vector<16x1xf32> to vector<16x16xf32>
    %112 = arith.divf %108, %111 : vector<16x16xf32>
    %c3 = arith.constant 3 : index
    %c0_42 = arith.constant 0 : index
    %c0_43 = arith.constant 0 : index
    %113 = vector.load %arg5[%c3, %c0_42, %c0_43] : memref<8x16x16xf32, #tpu.memory_space<vmem>>, vector<1x16x16xf32>
    %114 = vector.shape_cast %113 : vector<1x16x16xf32> to vector<16x16xf32>
    %115 = arith.mulf %112, %114 : vector<16x16xf32>
    %cst_44 = arith.constant dense<0.000000e+00> : vector<16x16xf32>
    %116 = tpu.matmul %115, %100, %cst_44 {dimension_numbers = #tpu.dot_dimension_numbers<[1], [0], [0], [1], [0, 0, 1, 1], [], []>} : vector<16x16xf32>, vector<16x16xf32>, vector<16x16xf32> -> vector<16x16xf32>
    %117 = vector.extract_strided_slice %40 {offsets = [0, 64], sizes = [16, 16], strides = [1, 1]} : vector<16x384xf32> to vector<16x16xf32>
    %118 = vector.extract_strided_slice %40 {offsets = [0, 192], sizes = [16, 16], strides = [1, 1]} : vector<16x384xf32> to vector<16x16xf32>
    %119 = vector.extract_strided_slice %40 {offsets = [0, 320], sizes = [16, 16], strides = [1, 1]} : vector<16x384xf32> to vector<16x16xf32>
    %cst_45 = arith.constant dense<0.000000e+00> : vector<16x16xf32>
    %120 = tpu.matmul %117, %118, %cst_45 {dimension_numbers = #tpu.dot_dimension_numbers<[1], [1], [0], [0], [0, 0, 1, 0], [], []>} : vector<16x16xf32>, vector<16x16xf32>, vector<16x16xf32> -> vector<16x16xf32>
    %cst_46 = arith.constant 1.000000e+00 : f32
    %121 = vector.broadcast %cst_46 : f32 to vector<16x16xf32>
    %122 = arith.mulf %120, %121 : vector<16x16xf32>
    %cst_47 = arith.constant dense<0xFF800000> : vector<16xf32>
    %123 = vector.multi_reduction <maximumf>, %122, %cst_47 [1] : vector<16x16xf32> to vector<16xf32>
    %124 = vector.shape_cast %123 : vector<16xf32> to vector<16x1xf32>
    %125 = vector.broadcast %124 : vector<16x1xf32> to vector<16x16xf32>
    %126 = arith.subf %122, %125 : vector<16x16xf32>
    %127 = math.exp %126 : vector<16x16xf32>
    %cst_48 = arith.constant dense<0.000000e+00> : vector<16xf32>
    %128 = vector.multi_reduction <add>, %127, %cst_48 [1] : vector<16x16xf32> to vector<16xf32>
    %129 = vector.shape_cast %128 : vector<16xf32> to vector<16x1xf32>
    %130 = vector.broadcast %129 : vector<16x1xf32> to vector<16x16xf32>
    %131 = arith.divf %127, %130 : vector<16x16xf32>
    %c4 = arith.constant 4 : index
    %c0_49 = arith.constant 0 : index
    %c0_50 = arith.constant 0 : index
    %132 = vector.load %arg5[%c4, %c0_49, %c0_50] : memref<8x16x16xf32, #tpu.memory_space<vmem>>, vector<1x16x16xf32>
    %133 = vector.shape_cast %132 : vector<1x16x16xf32> to vector<16x16xf32>
    %134 = arith.mulf %131, %133 : vector<16x16xf32>
    %cst_51 = arith.constant dense<0.000000e+00> : vector<16x16xf32>
    %135 = tpu.matmul %134, %119, %cst_51 {dimension_numbers = #tpu.dot_dimension_numbers<[1], [0], [0], [1], [0, 0, 1, 1], [], []>} : vector<16x16xf32>, vector<16x16xf32>, vector<16x16xf32> -> vector<16x16xf32>
    %136 = vector.extract_strided_slice %40 {offsets = [0, 80], sizes = [16, 16], strides = [1, 1]} : vector<16x384xf32> to vector<16x16xf32>
    %137 = vector.extract_strided_slice %40 {offsets = [0, 208], sizes = [16, 16], strides = [1, 1]} : vector<16x384xf32> to vector<16x16xf32>
    %138 = vector.extract_strided_slice %40 {offsets = [0, 336], sizes = [16, 16], strides = [1, 1]} : vector<16x384xf32> to vector<16x16xf32>
    %cst_52 = arith.constant dense<0.000000e+00> : vector<16x16xf32>
    %139 = tpu.matmul %136, %137, %cst_52 {dimension_numbers = #tpu.dot_dimension_numbers<[1], [1], [0], [0], [0, 0, 1, 0], [], []>} : vector<16x16xf32>, vector<16x16xf32>, vector<16x16xf32> -> vector<16x16xf32>
    %cst_53 = arith.constant 1.000000e+00 : f32
    %140 = vector.broadcast %cst_53 : f32 to vector<16x16xf32>
    %141 = arith.mulf %139, %140 : vector<16x16xf32>
    %cst_54 = arith.constant dense<0xFF800000> : vector<16xf32>
    %142 = vector.multi_reduction <maximumf>, %141, %cst_54 [1] : vector<16x16xf32> to vector<16xf32>
    %143 = vector.shape_cast %142 : vector<16xf32> to vector<16x1xf32>
    %144 = vector.broadcast %143 : vector<16x1xf32> to vector<16x16xf32>
    %145 = arith.subf %141, %144 : vector<16x16xf32>
    %146 = math.exp %145 : vector<16x16xf32>
    %cst_55 = arith.constant dense<0.000000e+00> : vector<16xf32>
    %147 = vector.multi_reduction <add>, %146, %cst_55 [1] : vector<16x16xf32> to vector<16xf32>
    %148 = vector.shape_cast %147 : vector<16xf32> to vector<16x1xf32>
    %149 = vector.broadcast %148 : vector<16x1xf32> to vector<16x16xf32>
    %150 = arith.divf %146, %149 : vector<16x16xf32>
    %c5 = arith.constant 5 : index
    %c0_56 = arith.constant 0 : index
    %c0_57 = arith.constant 0 : index
    %151 = vector.load %arg5[%c5, %c0_56, %c0_57] : memref<8x16x16xf32, #tpu.memory_space<vmem>>, vector<1x16x16xf32>
    %152 = vector.shape_cast %151 : vector<1x16x16xf32> to vector<16x16xf32>
    %153 = arith.mulf %150, %152 : vector<16x16xf32>
    %cst_58 = arith.constant dense<0.000000e+00> : vector<16x16xf32>
    %154 = tpu.matmul %153, %138, %cst_58 {dimension_numbers = #tpu.dot_dimension_numbers<[1], [0], [0], [1], [0, 0, 1, 1], [], []>} : vector<16x16xf32>, vector<16x16xf32>, vector<16x16xf32> -> vector<16x16xf32>
    %155 = vector.extract_strided_slice %40 {offsets = [0, 96], sizes = [16, 16], strides = [1, 1]} : vector<16x384xf32> to vector<16x16xf32>
    %156 = vector.extract_strided_slice %40 {offsets = [0, 224], sizes = [16, 16], strides = [1, 1]} : vector<16x384xf32> to vector<16x16xf32>
    %157 = vector.extract_strided_slice %40 {offsets = [0, 352], sizes = [16, 16], strides = [1, 1]} : vector<16x384xf32> to vector<16x16xf32>
    %cst_59 = arith.constant dense<0.000000e+00> : vector<16x16xf32>
    %158 = tpu.matmul %155, %156, %cst_59 {dimension_numbers = #tpu.dot_dimension_numbers<[1], [1], [0], [0], [0, 0, 1, 0], [], []>} : vector<16x16xf32>, vector<16x16xf32>, vector<16x16xf32> -> vector<16x16xf32>
    %cst_60 = arith.constant 1.000000e+00 : f32
    %159 = vector.broadcast %cst_60 : f32 to vector<16x16xf32>
    %160 = arith.mulf %158, %159 : vector<16x16xf32>
    %cst_61 = arith.constant dense<0xFF800000> : vector<16xf32>
    %161 = vector.multi_reduction <maximumf>, %160, %cst_61 [1] : vector<16x16xf32> to vector<16xf32>
    %162 = vector.shape_cast %161 : vector<16xf32> to vector<16x1xf32>
    %163 = vector.broadcast %162 : vector<16x1xf32> to vector<16x16xf32>
    %164 = arith.subf %160, %163 : vector<16x16xf32>
    %165 = math.exp %164 : vector<16x16xf32>
    %cst_62 = arith.constant dense<0.000000e+00> : vector<16xf32>
    %166 = vector.multi_reduction <add>, %165, %cst_62 [1] : vector<16x16xf32> to vector<16xf32>
    %167 = vector.shape_cast %166 : vector<16xf32> to vector<16x1xf32>
    %168 = vector.broadcast %167 : vector<16x1xf32> to vector<16x16xf32>
    %169 = arith.divf %165, %168 : vector<16x16xf32>
    %c6 = arith.constant 6 : index
    %c0_63 = arith.constant 0 : index
    %c0_64 = arith.constant 0 : index
    %170 = vector.load %arg5[%c6, %c0_63, %c0_64] : memref<8x16x16xf32, #tpu.memory_space<vmem>>, vector<1x16x16xf32>
    %171 = vector.shape_cast %170 : vector<1x16x16xf32> to vector<16x16xf32>
    %172 = arith.mulf %169, %171 : vector<16x16xf32>
    %cst_65 = arith.constant dense<0.000000e+00> : vector<16x16xf32>
    %173 = tpu.matmul %172, %157, %cst_65 {dimension_numbers = #tpu.dot_dimension_numbers<[1], [0], [0], [1], [0, 0, 1, 1], [], []>} : vector<16x16xf32>, vector<16x16xf32>, vector<16x16xf32> -> vector<16x16xf32>
    %174 = vector.extract_strided_slice %40 {offsets = [0, 112], sizes = [16, 16], strides = [1, 1]} : vector<16x384xf32> to vector<16x16xf32>
    %175 = vector.extract_strided_slice %40 {offsets = [0, 240], sizes = [16, 16], strides = [1, 1]} : vector<16x384xf32> to vector<16x16xf32>
    %176 = vector.extract_strided_slice %40 {offsets = [0, 368], sizes = [16, 16], strides = [1, 1]} : vector<16x384xf32> to vector<16x16xf32>
    %cst_66 = arith.constant dense<0.000000e+00> : vector<16x16xf32>
    %177 = tpu.matmul %174, %175, %cst_66 {dimension_numbers = #tpu.dot_dimension_numbers<[1], [1], [0], [0], [0, 0, 1, 0], [], []>} : vector<16x16xf32>, vector<16x16xf32>, vector<16x16xf32> -> vector<16x16xf32>
    %cst_67 = arith.constant 1.000000e+00 : f32
    %178 = vector.broadcast %cst_67 : f32 to vector<16x16xf32>
    %179 = arith.mulf %177, %178 : vector<16x16xf32>
    %cst_68 = arith.constant dense<0xFF800000> : vector<16xf32>
    %180 = vector.multi_reduction <maximumf>, %179, %cst_68 [1] : vector<16x16xf32> to vector<16xf32>
    %181 = vector.shape_cast %180 : vector<16xf32> to vector<16x1xf32>
    %182 = vector.broadcast %181 : vector<16x1xf32> to vector<16x16xf32>
    %183 = arith.subf %179, %182 : vector<16x16xf32>
    %184 = math.exp %183 : vector<16x16xf32>
    %cst_69 = arith.constant dense<0.000000e+00> : vector<16xf32>
    %185 = vector.multi_reduction <add>, %184, %cst_69 [1] : vector<16x16xf32> to vector<16xf32>
    %186 = vector.shape_cast %185 : vector<16xf32> to vector<16x1xf32>
    %187 = vector.broadcast %186 : vector<16x1xf32> to vector<16x16xf32>
    %188 = arith.divf %184, %187 : vector<16x16xf32>
    %c7 = arith.constant 7 : index
    %c0_70 = arith.constant 0 : index
    %c0_71 = arith.constant 0 : index
    %189 = vector.load %arg5[%c7, %c0_70, %c0_71] : memref<8x16x16xf32, #tpu.memory_space<vmem>>, vector<1x16x16xf32>
    %190 = vector.shape_cast %189 : vector<1x16x16xf32> to vector<16x16xf32>
    %191 = arith.mulf %188, %190 : vector<16x16xf32>
    %cst_72 = arith.constant dense<0.000000e+00> : vector<16x16xf32>
    %192 = tpu.matmul %191, %176, %cst_72 {dimension_numbers = #tpu.dot_dimension_numbers<[1], [0], [0], [1], [0, 0, 1, 1], [], []>} : vector<16x16xf32>, vector<16x16xf32>, vector<16x16xf32> -> vector<16x16xf32>
    %193 = tpu.concatenate %59, %78, %97, %116, %135, %154, %173, %192 in 1 : vector<16x16xf32>, vector<16x16xf32>, vector<16x16xf32>, vector<16x16xf32>, vector<16x16xf32>, vector<16x16xf32>, vector<16x16xf32>, vector<16x16xf32> -> vector<16x128xf32>
    %c0_73 = arith.constant 0 : index
    %c0_74 = arith.constant 0 : index
    %194 = vector.load %arg6[%c0_73, %c0_74] : memref<128x128xf32, #tpu.memory_space<vmem>>, vector<128x128xf32>
    %cst_75 = arith.constant dense<0.000000e+00> : vector<16x128xf32>
    %195 = tpu.matmul %193, %194, %cst_75 {dimension_numbers = #tpu.dot_dimension_numbers<[1], [0], [0], [1], [0, 0, 1, 1], [], []>} : vector<16x128xf32>, vector<128x128xf32>, vector<16x128xf32> -> vector<16x128xf32>
    %c0_76 = arith.constant 0 : index
    %c0_77 = arith.constant 0 : index
    %196 = vector.load %arg7[%c0_76, %c0_77] : memref<1x128xf32, #tpu.memory_space<vmem>>, vector<1x128xf32>
    %197 = vector.broadcast %196 : vector<1x128xf32> to vector<16x128xf32>
    %198 = arith.addf %195, %197 : vector<16x128xf32>
    %199 = arith.addf %1, %198 : vector<16x128xf32>
    %c0_78 = arith.constant 0 : index
    %c0_79 = arith.constant 0 : index
    %200 = vector.load %arg8[%c0_78, %c0_79] : memref<1x128xf32, #tpu.memory_space<vmem>>, vector<1x128xf32>
    %c0_80 = arith.constant 0 : index
    %c0_81 = arith.constant 0 : index
    %201 = vector.load %arg9[%c0_80, %c0_81] : memref<1x128xf32, #tpu.memory_space<vmem>>, vector<1x128xf32>
    %cst_82 = arith.constant dense<0.000000e+00> : vector<16xf32>
    %202 = vector.multi_reduction <add>, %199, %cst_82 [1] : vector<16x128xf32> to vector<16xf32>
    %203 = vector.shape_cast %202 : vector<16xf32> to vector<16x1xf32>
    %cst_83 = arith.constant 1.280000e+02 : f32
    %204 = vector.broadcast %cst_83 : f32 to vector<16x1xf32>
    %205 = arith.divf %203, %204 : vector<16x1xf32>
    %206 = vector.broadcast %205 : vector<16x1xf32> to vector<16x128xf32>
    %207 = arith.subf %199, %206 : vector<16x128xf32>
    %208 = arith.mulf %207, %207 : vector<16x128xf32>
    %cst_84 = arith.constant dense<0.000000e+00> : vector<16xf32>
    %209 = vector.multi_reduction <add>, %208, %cst_84 [1] : vector<16x128xf32> to vector<16xf32>
    %210 = vector.shape_cast %209 : vector<16xf32> to vector<16x1xf32>
    %cst_85 = arith.constant 1.280000e+02 : f32
    %211 = vector.broadcast %cst_85 : f32 to vector<16x1xf32>
    %212 = arith.divf %210, %211 : vector<16x1xf32>
    %213 = vector.broadcast %205 : vector<16x1xf32> to vector<16x128xf32>
    %214 = arith.subf %199, %213 : vector<16x128xf32>
    %cst_86 = arith.constant 9.99999974E-6 : f32
    %215 = vector.broadcast %cst_86 : f32 to vector<16x1xf32>
    %216 = arith.addf %212, %215 : vector<16x1xf32>
    %217 = math.rsqrt %216 : vector<16x1xf32>
    %218 = vector.broadcast %217 : vector<16x1xf32> to vector<16x128xf32>
    %219 = arith.mulf %214, %218 : vector<16x128xf32>
    %220 = vector.broadcast %200 : vector<1x128xf32> to vector<16x128xf32>
    %221 = arith.mulf %219, %220 : vector<16x128xf32>
    %222 = vector.broadcast %201 : vector<1x128xf32> to vector<16x128xf32>
    %223 = arith.addf %221, %222 : vector<16x128xf32>
    %c0_87 = arith.constant 0 : index
    %c0_88 = arith.constant 0 : index
    %224 = vector.load %arg10[%c0_87, %c0_88] : memref<128x256xf32, #tpu.memory_space<vmem>>, vector<128x256xf32>
    %cst_89 = arith.constant dense<0.000000e+00> : vector<16x256xf32>
    %225 = tpu.matmul %223, %224, %cst_89 {dimension_numbers = #tpu.dot_dimension_numbers<[1], [0], [0], [1], [0, 0, 1, 1], [], []>} : vector<16x128xf32>, vector<128x256xf32>, vector<16x256xf32> -> vector<16x256xf32>
    %c0_90 = arith.constant 0 : index
    %c0_91 = arith.constant 0 : index
    %226 = vector.load %arg11[%c0_90, %c0_91] : memref<1x256xf32, #tpu.memory_space<vmem>>, vector<1x256xf32>
    %227 = vector.broadcast %226 : vector<1x256xf32> to vector<16x256xf32>
    %228 = arith.addf %225, %227 : vector<16x256xf32>
    %cst_92 = arith.constant 5.000000e-01 : f32
    %229 = vector.broadcast %cst_92 : f32 to vector<16x256xf32>
    %230 = arith.mulf %229, %228 : vector<16x256xf32>
    %cst_93 = arith.constant 4.471500e-02 : f32
    %231 = vector.broadcast %cst_93 : f32 to vector<16x256xf32>
    %232 = arith.mulf %231, %228 : vector<16x256xf32>
    %233 = arith.mulf %232, %228 : vector<16x256xf32>
    %234 = arith.mulf %233, %228 : vector<16x256xf32>
    %235 = arith.addf %228, %234 : vector<16x256xf32>
    %cst_94 = arith.constant 0.797884583 : f32
    %236 = vector.broadcast %cst_94 : f32 to vector<16x256xf32>
    %237 = arith.mulf %236, %235 : vector<16x256xf32>
    %238 = math.tanh %237 : vector<16x256xf32>
    %cst_95 = arith.constant 1.000000e+00 : f32
    %239 = vector.broadcast %cst_95 : f32 to vector<16x256xf32>
    %240 = arith.addf %239, %238 : vector<16x256xf32>
    %241 = arith.mulf %230, %240 : vector<16x256xf32>
    %c0_96 = arith.constant 0 : index
    %c0_97 = arith.constant 0 : index
    %242 = vector.load %arg12[%c0_96, %c0_97] : memref<256x128xf32, #tpu.memory_space<vmem>>, vector<256x128xf32>
    %cst_98 = arith.constant dense<0.000000e+00> : vector<16x128xf32>
    %243 = tpu.matmul %241, %242, %cst_98 {dimension_numbers = #tpu.dot_dimension_numbers<[1], [0], [0], [1], [0, 0, 1, 1], [], []>} : vector<16x256xf32>, vector<256x128xf32>, vector<16x128xf32> -> vector<16x128xf32>
    %c0_99 = arith.constant 0 : index
    %c0_100 = arith.constant 0 : index
    %244 = vector.load %arg13[%c0_99, %c0_100] : memref<1x128xf32, #tpu.memory_space<vmem>>, vector<1x128xf32>
    %245 = vector.broadcast %244 : vector<1x128xf32> to vector<16x128xf32>
    %246 = arith.addf %243, %245 : vector<16x128xf32>
    %247 = arith.addf %199, %246 : vector<16x128xf32>
    %c0_101 = arith.constant 0 : index
    %c0_102 = arith.constant 0 : index
    %c0_103 = arith.constant 0 : index
    %248 = vector.load %arg14[%c0_101, %c0_102, %c0_103] : memref<1x16x128xf32, #tpu.memory_space<vmem>>, vector<1x16x128xf32>
    %249 = vector.shape_cast %248 : vector<1x16x128xf32> to vector<16x128xf32>
    %250 = vector.shape_cast %247 : vector<16x128xf32> to vector<1x16x128xf32>
    tpu.vector_store %arg14[%c0_101, %c0_102, %c0_103], %250 {strides = array<i32>} : memref<1x16x128xf32, #tpu.memory_space<vmem>>, vector<1x16x128xf32>,
    return
  }
  func.func @transform_0(%arg0: i32) -> (i32, i32, i32) {
    %c0_i32 = arith.constant 0 : i32
    %c0_i32_0 = arith.constant 0 : i32
    %c0_i32_1 = arith.constant 0 : i32
    return %arg0, %c0_i32, %c0_i32_0 : i32, i32, i32
  }
  func.func @transform_1(%arg0: i32) -> (i32, i32) {
    %c0_i32 = arith.constant 0 : i32
    %c0_i32_0 = arith.constant 0 : i32
    %c0_i32_1 = arith.constant 0 : i32
    return %c0_i32, %c0_i32_0 : i32, i32
  }
  func.func @transform_2(%arg0: i32) -> (i32, i32) {
    %c0_i32 = arith.constant 0 : i32
    %c0_i32_0 = arith.constant 0 : i32
    %c0_i32_1 = arith.constant 0 : i32
    return %c0_i32, %c0_i32_0 : i32, i32
  }
  func.func @transform_3(%arg0: i32) -> (i32, i32) {
    %c0_i32 = arith.constant 0 : i32
    %c0_i32_0 = arith.constant 0 : i32
    %c0_i32_1 = arith.constant 0 : i32
    return %c0_i32, %c0_i32_0 : i32, i32
  }
  func.func @transform_4(%arg0: i32) -> (i32, i32, i32) {
    %c0_i32 = arith.constant 0 : i32
    %c0_i32_0 = arith.constant 0 : i32
    %c0_i32_1 = arith.constant 0 : i32
    %c0_i32_2 = arith.constant 0 : i32
    return %c0_i32, %c0_i32_0, %c0_i32_1 : i32, i32, i32
  }
  func.func @transform_5(%arg0: i32) -> (i32, i32) {
    %c0_i32 = arith.constant 0 : i32
    %c0_i32_0 = arith.constant 0 : i32
    %c0_i32_1 = arith.constant 0 : i32
    return %c0_i32, %c0_i32_0 : i32, i32
  }
  func.func @transform_6(%arg0: i32) -> (i32, i32) {
    %c0_i32 = arith.constant 0 : i32
    %c0_i32_0 = arith.constant 0 : i32
    %c0_i32_1 = arith.constant 0 : i32
    return %c0_i32, %c0_i32_0 : i32, i32
  }
  func.func @transform_7(%arg0: i32) -> (i32, i32) {
    %c0_i32 = arith.constant 0 : i32
    %c0_i32_0 = arith.constant 0 : i32
    %c0_i32_1 = arith.constant 0 : i32
    return %c0_i32, %c0_i32_0 : i32, i32
  }
  func.func @transform_8(%arg0: i32) -> (i32, i32) {
    %c0_i32 = arith.constant 0 : i32
    %c0_i32_0 = arith.constant 0 : i32
    %c0_i32_1 = arith.constant 0 : i32
    return %c0_i32, %c0_i32_0 : i32, i32
  }
  func.func @transform_9(%arg0: i32) -> (i32, i32) {
    %c0_i32 = arith.constant 0 : i32
    %c0_i32_0 = arith.constant 0 : i32
    %c0_i32_1 = arith.constant 0 : i32
    return %c0_i32, %c0_i32_0 : i32, i32
  }
  func.func @transform_10(%arg0: i32) -> (i32, i32) {
    %c0_i32 = arith.constant 0 : i32
    %c0_i32_0 = arith.constant 0 : i32
    %c0_i32_1 = arith.constant 0 : i32
    return %c0_i32, %c0_i32_0 : i32, i32
  }
  func.func @transform_11(%arg0: i32) -> (i32, i32) {
    %c0_i32 = arith.constant 0 : i32
    %c0_i32_0 = arith.constant 0 : i32
    %c0_i32_1 = arith.constant 0 : i32
    return %c0_i32, %c0_i32_0 : i32, i32
  }
  func.func @transform_12(%arg0: i32) -> (i32, i32) {
    %c0_i32 = arith.constant 0 : i32
    %c0_i32_0 = arith.constant 0 : i32
    %c0_i32_1 = arith.constant 0 : i32
    return %c0_i32, %c0_i32_0 : i32, i32
  }
  func.func @transform_13(%arg0: i32) -> (i32, i32, i32) {
    %c0_i32 = arith.constant 0 : i32
    %c0_i32_0 = arith.constant 0 : i32
    %c0_i32_1 = arith.constant 0 : i32
    return %arg0, %c0_i32, %c0_i32_0 : i32, i32, i32
  }
}

</mosaic_0001>

<bundles_post_ra>
// kernel: tpu_custom_call.1
= control target key start
LH: loop header
LB: loop body
LE: loop exit
PB: predicated region body
PF: predicated region fallthrough
CT: control target
= control target key end

     0   :  { %s3750_s0 = inlined_call_operand.hbm [shape: f32[2,16,128], index: 0, kind: input, shape index: {}]   ;;  %s3751_s1 = inlined_call_operand.hbm [shape: f32[1,128], index: 1, kind: input, shape index: {}]   ;;  %s3752_s2 = inlined_call_operand.vmem [shape: f32[1,128], index: 2, kind: input, shape index: {}]   ;;  %s3753_s3 = inlined_call_operand.hbm [shape: f32[128,384], index: 3, kind: input, shape index: {}]   ;;  %s3754_s4 = inlined_call_operand.hbm [shape: f32[8,16,16], index: 4, kind: input, shape index: {}]   ;;  %s3755_s5 = inlined_call_operand.hbm [shape: f32[128,128], index: 5, kind: input, shape index: {}]   ;;  %s3756_s6 = inlined_call_operand.vmem [shape: f32[1,128], index: 6, kind: input, shape index: {}]   ;;  %s3757_s7 = inlined_call_operand.vmem [shape: f32[1,128], index: 7, kind: input, shape index: {}]   ;;  %s3758_s8 = inlined_call_operand.vmem [shape: f32[1,128], index: 8, kind: input, shape index: {}]   ;;  %s3759_s9 = inlined_call_operand.hbm [shape: f32[128,256], index: 9, kind: input, shape index: {}]   ;;  %s3760_s10 = inlined_call_operand.vmem [shape: f32[1,256], index: 10, kind: input, shape index: {}]   ;;  %s3761_s11 = inlined_call_operand.hbm [shape: f32[256,128], index: 11, kind: input, shape index: {}]   ;;  %s3762_s12 = inlined_call_operand.vmem [shape: f32[1,128], index: 12, kind: input, shape index: {}]   ;;  %s3763_s13 = inlined_call_operand.hbm [shape: f32[2,16,128], index: 13, kind: output, shape index: {}]  }
   0x1   :  { %3767 = sst [smem:[#allocation20_spill]] %s3751_s1 }
   0x2   :  { %3768 = sst [smem:[#allocation21_spill]] %s3753_s3 }
   0x3   :  { %3769 = sst [smem:[#allocation22_spill]] %s3754_s4 }
   0x4   :  { %3770 = sst [smem:[#allocation23_spill]] %s3755_s5 }
   0x5   :  { %3771 = sst [smem:[#allocation24_spill]] %s3759_s9 }
   0x6   :  { %3772 = sst [smem:[#allocation25_spill]] %s3761_s11 }
   0x7   :  { %3773 = sst [smem:[#allocation26_spill]] %s3762_s12 }
   0x8   :  { %3774 = sst [smem:[#allocation27_spill]] %s3763_s13 }
   0x9   :  { %18 = vsyncpa [#allocation3], 0 }
   0xa   :  { %20 = vsyncpa [#allocation3 + $0x1], 0 }
   0xb   :  { %21 = vsyncpa [#allocation6], 0 }
   0xc   :  { %22 = vsyncpa [#allocation9], 0 }
   0xd   :  { %23 = vsyncpa [#allocation12], 0 }
   0xe   :  { %24 = vsyncpa [#allocation4], 0 }
   0xf   :  { %26 = vsyncpa [#allocation4 + $0x1], 0  ;;  %s3041_s25 = smov 0   ;;  %s3043_s26 = smov 0  }
  0x10   :  { %s3045_s27 = smov 0   ;;  %s3047_s28 = smov 0  }
  0x11 LB: > { %s3775_s1 = sld [smem:[#allocation20_spill]]  ;;  %s3065_s15 = sadd.s32 4294967295, %s2946_s28   ;;  %s2946_s28 = sphi %s3047_s28, %s3804_s28   ;;  %s2942_s27 = sphi %s3045_s27, %s3803_s27   ;;  %s2938_s26 = sphi %s3043_s26, %s3802_s26   ;;  %s2934_s25 = sphi %s3041_s25, %s3801_s25  }
  0x12   : > { %p2312_p0 = scmp.ge.s32.totalorder %s2946_s28, 1  ;;  %p53_p1 = scmp.eq.s32.totalorder %s3065_s15, 0 }
  0x13   : > { %p341_p2 = scmp.lt.s32.totalorder %s2946_s28, 3  ;;  %s2948_s17 = smov [#allocation5]  }
  0x14   : > { %s355_s18 = sshll.u32 %s2948_s17, 4  ;;  %s3777_s4 = sld [smem:[#allocation22_spill]]  ;;  %s356_s18 = int_to_ptr.vmem [resolvable:$true] %s355_s18 }
  0x15   : > { %p3070_p3 = pnand %p2312_p0, %p341_p2  ;;  %s2949_s23 = smov [#allocation8]  }
  0x16   : > { %s383_s24 = sshll.u32 %s2949_s23, 4  ;;  %s3765_s29 = smov 128   ;;  %s384_s24 = int_to_ptr.vmem [resolvable:$true] %s383_s24 }
  0x17   : > { %s353_s14 = sshll.u32 %s3775_s1, 4  ;;  %p2417_p5 = pneg %p3070_p3  ;;  %s354_s14 = int_to_ptr.hbm [resolvable:$true] %s353_s14 }
  0x18   : > { %s3766_s30 = smov 8   ;;  %s3779_s9 = sld [smem:[#allocation24_spill]] }
  0x19   : > { %p3082_p6 = pnand %p2417_p5, %p53_p1  ;;  %s2952_s1 = smov [#allocation11]  }
  0x1a   : > { %s381_s21 = sshll.u32 %s3777_s4, 4  ;;  %s420_s4 = sshll.u32 %s2952_s1, 4  ;;  %s382_s21 = int_to_ptr.hbm [resolvable:$true] %s381_s21  ;;  %s421_s4 = int_to_ptr.vmem [resolvable:$true] %s420_s4 }
  0x1b   : > { %2420 = dma.hbm_to_vmem [thread:$0]  (!%p3082_p6), %s354_s14, 16, %s356_s18, [#allocation6]  }
  0x1c   : > { %2426 = dma.hbm_to_vmem [thread:$0]  (!%p3082_p6), %s382_s21, 2048, %s384_s24, [#allocation9], %s3765_s29, %s3765_s29, %s3766_s30  }
  0x1d   : > { %s3780_s3 = sld [smem:[#allocation21_spill]]  ;;  %s2953_s18 = smov 256  }
  0x1e   : > { %s418_s20 = sshll.u32 %s3779_s9, 4  ;;  %s2954_s12 = smov 16   ;;  %s419_s20 = int_to_ptr.hbm [resolvable:$true] %s418_s20 }
  0x1f   : > { %2432 = dma.hbm_to_vmem [thread:$0]  (!%p3082_p6), %s419_s20, 4096, %s421_s4, [#allocation12], %s2953_s18, %s2953_s18, %s2954_s12  }
  0x20   : > { %s2955_s21 = smov [#allocation7]   ;;  %s2956_s17 = smov 384  }
  0x21   : > { %s369_s24 = sshll.u32 %s2955_s21, 4  ;;  %s2957_s19 = smov 24   ;;  %s370_s24 = int_to_ptr.vmem [resolvable:$true] %s369_s24 }
  0x22   : > { %s3781_s5 = sld [smem:[#allocation23_spill]]  ;;  %s2958_s4 = smov [#allocation10]  }
  0x23   : > { %s367_s14 = sshll.u32 %s3780_s3, 4  ;;  %s397_s12 = sshll.u32 %s2958_s4, 4  ;;  %s368_s14 = int_to_ptr.hbm [resolvable:$true] %s367_s14  ;;  %s398_s12 = int_to_ptr.vmem [resolvable:$true] %s397_s12 }
  0x24   : > { %2423 = dma.hbm_to_vmem [thread:$0]  (!%p3082_p6), %s368_s14, 6144, %s370_s24, [#allocation6], %s2956_s17, %s2956_s17, %s2957_s19  }
  0x25   : > { %s3782_s11 = sld [smem:[#allocation25_spill]]  ;;  %s2959_s14 = smov [#allocation13]  }
  0x26   : > { %s437_s24 = sshll.u32 %s2959_s14, 4  ;;  %s2311_s17 = sadd.s32 4294967294, %s2946_s28   ;;  %s438_s24 = int_to_ptr.vmem [resolvable:$true] %s437_s24 }
  0x27   : > { %s3121_s19 = sadd.s32 1, %s2946_s28   ;;  %s39_s13 = sadd.s32 1, %s2942_s27 }
  0x28   : > { %s395_s23 = sshll.u32 %s3781_s5, 4  ;;  %s36_s1 = ssub.s32 %s2946_s28, %s3121_s19  ;;  %s396_s23 = int_to_ptr.hbm [resolvable:$true] %s395_s23 }
  0x29   : > { %2429 = dma.hbm_to_vmem [thread:$0]  (!%p3082_p6), %s396_s23, 2048, %s398_s12, [#allocation9], %s3765_s29, %s3765_s29, %s3766_s30  }
  0x2a   : > { %p37_p7 = scmp.eq.s32.totalorder %s36_s1, 0  ;;  %p46_p8 = scmp.ne.s32.totalorder %s2942_s27, %s2938_s26 }
  0x2b   : > { %s435_s21 = sshll.u32 %s3782_s11, 4  ;;  %p47_p9 = scmp.eq.s32.totalorder %s2946_s28, 0  ;;  %s436_s21 = int_to_ptr.hbm [resolvable:$true] %s435_s21 }
  0x2c   : > { %2435 = dma.hbm_to_vmem [thread:$0]  (!%p3082_p6), %s436_s21, 4096, %s438_s24, [#allocation12], %s3765_s29, %s3765_s29, %s3766_s30  }
  0x2d   : > { %p52_p10 = scmp.ne.s32.totalorder %s2938_s26, %s2934_s25  ;;  %p3134_p11 = por %p47_p9, %p46_p8 }
  0x2e   : > { %s3132_s23 = scalar_select %p37_p7, %s2942_s27, %s39_s13  }
  0x2f   : > { %p3140_p12 = por %p53_p1, %p52_p10  ;;  %p328_p13 = scmp.eq.s32.totalorder %s3065_s15, 1 }
  0x30   : > { %p334_p0 = scmp.eq.s32.totalorder %s2311_s17, 1  ;;  %p2450_p2 = scmp.lt.s32.totalorder %s2946_s28, 2 }
  0x31   : > { %s454_s12 = sand.u32 1, %s2942_s27   ;;  %p3147_p5 = por %p328_p13, %p46_p8 }
  0x32   : > { %p3151_p6 = por %p334_p0, %p52_p10  ;;  %s2320_s21 = sshll.u32 %s454_s12, 4 }
  0x33   : > { %s2387_s14 = sshll.u32 %s2946_s28, 4  ;;  %s458_s29 = scalar_lea.vmem [#allocation2], %s2320_s21 }
  0x34   : > { %s463_s13 = scalar_lea.hbm %s3750_s0, %s2387_s14  ;;  %s466_s30 = sshll.u32 %s458_s29, 4  ;;  %s467_s30 = int_to_ptr.vmem [resolvable:$true] %s466_s30 }
  0x35   : > { %s464_s3 = sshll.u32 %s463_s13, 4  ;;  %p3161_p7 = pnand %p2450_p2, %p3134_p11  ;;  %s465_s3 = int_to_ptr.hbm [resolvable:$true] %s464_s3 }
  0x36   : > { %s455_s5 = scalar_lea.sflag [#allocation3], %s454_s12  ;;  %s2838_s9 = sshra.s32 %s465_s3, 4  ;;  %s2839_s9 = int_to_ptr.hbm [resolvable:$true] %s2838_s9 }
  0x37   : > { %s2840_s11 = scalar_lea.hbm %s2839_s9, 16  ;;  %p2842_p9 = pneg %p3161_p7 }
  0x38   : > { %p2841_p8 = scmp.ne.s32.totalorder %s2839_s9, %s2840_s11  ;;  %s2845_s14 = scalar_lea.hbm %s3750_s0, 32 }
  0x39   : > { %p2846_p11 = scmp.lt.s32.totalorder %s2839_s9, %s3750_s0  ;;  %p2847_p0 = scmp.lt.s32.totalorder %s2845_s14, %s2840_s11 }
  0x3a   : > { %p2843_p10 = pnand %p2842_p9, %p2841_p8 }
  0x3b   : > { %p2848_p2 = por %p2847_p0, %p2846_p11 }
  0x3c   : > { %p2844_p13 = pneg %p2843_p10 }
  0x3e   : > { %p2849_p4 = pnand %p2848_p2, %p2844_p13 }
  0x40   : > { %2852 = shalt.err (!%p2849_p4)
}
  0x41   : > { %s3788_s12 = smov 8   ;;  %s3789_s1 = smov 128  }
  0x42   : > { %2439 = dma.hbm_to_vmem [thread:$0]  (!%p3161_p7), %s465_s3, 256, %s467_s30, %s455_s5, %s3789_s1, %s3789_s1, %s3788_s12  }
  0x43   : > { %478 = sbr.rel (%p3070_p3) target bundleno = 2523 (0x9db), region = 72  ;;  %s3181_s13 = sand.u32 (!%p3070_p3), 1, %s2938_s26  }
  0x44   : > { %s2324_s9 = sshll.u32 (!%p3070_p3), %s3181_s13, 4  ;;  %s481_s11 = scalar_lea.sflag (!%p3070_p3), [#allocation3], %s3181_s13 }
  0x45   : > { %s3187_s21 = scalar_lea.vmem (!%p3070_p3), [#allocation2], %s2324_s9 }
  0x48   : > { %2913 = dma.done.wait (%p3140_p12), %s481_s11, 256  }
  0x49   : > { %2915 = vsyncadd (%p3140_p12), %s481_s11, 4294967040 }
  0x4a   : > { %2917 = dma.done.wait (%p53_p1), [#allocation6], 6160  }
  0x4b   : > { %2919 = vsyncadd (%p53_p1), [#allocation6], 4294961136 }
  0x4c   : > { %2921 = dma.done.wait (%p53_p1), [#allocation9], 4096  }
  0x4d   : > { %2923 = vsyncadd (%p53_p1), [#allocation9], 4294963200 }
  0x4e   : > { %2925 = dma.done.wait (%p53_p1), [#allocation12], 8192  }
  0x4f   : > { %2927 = vsyncadd (%p53_p1), [#allocation12], 4294959104  ;;  %v559_v0 = vld [vmem:[%s3187_s21 + $0x8] sm:$0xff]  ;;  %v558_v1 = vld [vmem:[%s3187_s21] sm:$0xff]  ;;  %v2960_v2 = vmov 128.0   ;;  %v619_v43 = vlaneseq  ;;  %vm629_vm8 = vcmask 130048  }
  0x50   : > { %564 = vadd.xlane.f32.xlu0 %v559_v0  ;;  %2574 = vrcp.f32 %v2960_v2  ;;  %v707_v26 = vld [vmem:[#allocation7 + $0x168] sm:$0xff]  ;;  %v708_v27 = vld [vmem:[#allocation7 + $0x170] sm:$0xff]  ;;  %v709_v28 = vld [vmem:[#allocation7 + $0x178] sm:$0xff]  ;;  %s2962_s16 = smov 112   ;;  %s2963_s30 = smov 96  }
  0x51   : > { %710 = vmatpush.msra.mxu1 %v707_v26  ;;  %733 = vmatpush.msra.mxu2 %v708_v27  ;;  %v704_v29 = vld [vmem:[#allocation7 + $0x150] sm:$0xff]  ;;  %v705_v30 = vld [vmem:[#allocation7 + $0x158] sm:$0xff]  ;;  %v706_v31 = vld [vmem:[#allocation7 + $0x160] sm:$0xff]  ;;  %v3225_v56 = vand.u32 127, %v619_v43  ;;  %s2964_s4 = smov 80   ;;  %s2965_s17 = smov 48  }
  0x52   : > { %756 = vmatpush.msra.mxu3 %v709_v28  ;;  %v701_v33 = vld [vmem:[#allocation7 + $0x138] sm:$0xff]  ;;  %v702_v34 = vld [vmem:[#allocation7 + $0x140] sm:$0xff]  ;;  %v703_v35 = vld [vmem:[#allocation7 + $0x148] sm:$0xff]  ;;  %s2966_s29 = smov 64   ;;  %s2967_s14 = smov 32  }
  0x53   : > { %711 = vmatpush.msra.mxu1 %v704_v29  ;;  %734 = vmatpush.msra.mxu2 %v705_v30  ;;  %v698_v37 = vld [vmem:[#allocation7 + $0x120] sm:$0xff]  ;;  %v699_v38 = vld [vmem:[#allocation7 + $0x128] sm:$0xff]  ;;  %v700_v40 = vld [vmem:[#allocation7 + $0x130] sm:$0xff]  ;;  %vm659_vm10 = vcmp.lt.s32.totalorder %v3225_v56, 64  ;;  %s2968_s24 = smov 16   ;;  %s3799_s12 = sld [smem:[#allocation27_spill]] }
  0x54   : > { %757 = vmatpush.msra.mxu3 %v706_v31  ;;  %v695_v44 = vld [vmem:[#allocation7 + $0x108] sm:$0xff]  ;;  %v696_v45 = vld [vmem:[#allocation7 + $0x110] sm:$0xff]  ;;  %v2568_v46 = vld [vmem:[#allocation5] ss:$0 sm:$0xff]  ;;  %s2166_s3 = scalar_lea.sflag [#allocation4], %s3181_s13 }
  0x55   : > { %712 = vmatpush.msra.mxu1 %v701_v33  ;;  %735 = vmatpush.msra.mxu2 %v702_v34  ;;  %v697_v47 = vld [vmem:[#allocation7 + $0x118] sm:$0xff]  ;;  %v692_v50 = vld [vmem:[#allocation7 + $0xf0] sm:$0xff]  ;;  %v694_v54 = vld [vmem:[#allocation7 + $0x100] sm:$0xff] }
  0x56   : > { %v2575_v3 = vpop.eup %2574  ;;  %758 = vmatpush.msra.mxu3 %v703_v35  ;;  %v693_v51 = vld [vmem:[#allocation7 + $0xf8] sm:$0xff]  ;;  %v690_v58 = vld [vmem:[#allocation7 + $0xe0] sm:$0xff]  ;;  %v691_v60 = vld [vmem:[#allocation7 + $0xe8] sm:$0xff] }
  0x57   : > { %v567_v4 = vmul.f32 128.0, %v2575_v3  ;;  %vm571_vm0 = vweird.f32 %v2575_v3  ;;  %713 = vmatpush.msra.mxu1 %v698_v37  ;;  %736 = vmatpush.msra.mxu2 %v699_v38  ;;  %v2569_v53 = vld [vmem:[%s3752_s2] ss:$0 sm:$0xff]  ;;  %v686_v62 = vld [vmem:[#allocation7 + $0xc0] sm:$0xff]  ;;  %v672_v26 = vld [vmem:[#allocation7 + $0x50] sm:$0xff] }
  0x58   : > { %562 = vadd.xlane.f32.xlu0 %v558_v1  ;;  %759 = vmatpush.msra.mxu3 %v700_v40  ;;  %v689_v57 = vld [vmem:[#allocation7 + $0xd8] sm:$0xff]  ;;  %v668_v28 = vld [vmem:[#allocation7 + $0x30] sm:$0xff]  ;;  %v670_v30 = vld [vmem:[#allocation7 + $0x40] sm:$0xff] }
  0x59   : > { %v568_v5 = vsub.f32 1.0, %v567_v4  ;;  %714 = vmatpush.msra.mxu1 %v695_v44  ;;  %737 = vmatpush.msra.mxu2 %v696_v45  ;;  %v624_v4 = vadd.s32 1, %v3225_v56  ;;  %v673_v27 = vld [vmem:[#allocation7 + $0x58] sm:$0xff]  ;;  %v667_v33 = vld [vmem:[#allocation7 + $0x28] sm:$0xff]  ;;  %v662_v35 = vld [vmem:[#allocation7] sm:$0xff] }
  0x5a   : > { %760 = vmatpush.msra.mxu3 %v697_v47  ;;  %v669_v29 = vld [vmem:[#allocation7 + $0x38] sm:$0xff]  ;;  %v664_v37 = vld [vmem:[#allocation7 + $0x10] sm:$0xff] }
  0x5b   : > { %v569_v6 = vmul.f32 %v2575_v3, %v568_v5  ;;  %715 = vmatpush.msra.mxu1 %v692_v50  ;;  %738 = vmatpush.msra.mxu2 %v693_v51  ;;  %v683_v5 = vld [vmem:[#allocation7 + $0xa8] sm:$0xff]  ;;  %v665_v31 = vld [vmem:[#allocation7 + $0x18] sm:$0xff] }
  0x5c   : > { %761 = vmatpush.msra.mxu3 %v694_v54 }
  0x5d   : > { %v570_v7 = vadd.f32 %v2575_v3, %v569_v6  ;;  %716 = vmatpush.msra.mxu1 %v689_v57  ;;  %739 = vmatpush.msra.mxu2 %v690_v58  ;;  %v684_v6 = vld [vmem:[#allocation7 + $0xb0] sm:$0xff] }
  0x5e   : > { %762 = vmatpush.msra.mxu3 %v691_v60 }
  0x5f   : > { %v3207_v8 = vsel %vm571_vm0, %v2575_v3, %v570_v7  ;;  %v620_v3 = vshrl.u32 %v619_v43, 7  ;;  %717 = vmatpush.msra.mxu1 %v686_v62  ;;  %v685_v7 = vld [vmem:[#allocation7 + $0xb8] sm:$0xff] }
  0x61   : > { %718 = vmatpush.msra.mxu1 %v683_v5  ;;  %vm625_vm7 = vcmp.eq.s32.totalorder %v620_v3, %v624_v4 }
  0xc3   : > { %v565_v9 = vpop.xlane.xlu0 %564 }
  0xc4   : > { %v574_v10 = vmul.f32 %v3207_v8, %v565_v9 }
  0xc6   : > { %v576_v11 = vsub.f32 %v559_v0, %v574_v10  ;;  %v687_v0 = vld [vmem:[#allocation7 + $0xc8] sm:$0xff]  ;;  %v680_v10 = vld [vmem:[#allocation7 + $0x90] sm:$0xff] }
  0xc7   : > { %740 = vmatpush.msra.mxu2 %v687_v0  ;;  %719 = vmatpush.msra.mxu1 %v680_v10 }
  0xc8   : > { %v578_v12 = vmul.f32 %v576_v11, %v576_v11 }
  0xc9   : > { %741 = vmatpush.msra.mxu2 %v684_v6 }
  0xca   : > { %581 = vadd.xlane.f32.xlu1 %v578_v12  ;;  %v681_v12 = vld [vmem:[#allocation7 + $0x98] sm:$0xff] }
  0xcb   : > { %v563_v13 = vpop.xlane.xlu0 %562  ;;  %742 = vmatpush.msra.mxu2 %v681_v12 }
  0xcc   : > { %v573_v14 = vmul.f32 %v3207_v8, %v563_v13  ;;  %v682_v13 = vld [vmem:[#allocation7 + $0xa0] sm:$0xff] }
  0xce   : > { %v3211_v15 = vsub.f32 %v558_v1, %v573_v14  ;;  %v688_v1 = vld [vmem:[#allocation7 + $0xd0] sm:$0xff]  ;;  %v677_v14 = vld [vmem:[#allocation7 + $0x78] sm:$0xff] }
  0xcf   : > { %763 = vmatpush.msra.mxu3 %v688_v1  ;;  %720 = vmatpush.msra.mxu1 %v677_v14 }
  0xd0   : > { %v577_v16 = vmul.f32 %v3211_v15, %v3211_v15 }
  0xd1   : > { %764 = vmatpush.msra.mxu3 %v685_v7 }
  0xd2   : > { %579 = vadd.xlane.f32.xlu1 %v577_v16 }
  0xd3   : > { %765 = vmatpush.msra.mxu3 %v682_v13 }
 0x13d   : > { %v582_v17 = vpop.xlane.xlu1 %581 }
 0x13e   : > { %v584_v18 = vmul.f32 %v582_v17, %v3207_v8  ;;  %v678_v17 = vld [vmem:[#allocation7 + $0x80] sm:$0xff] }
 0x13f   : > { %743 = vmatpush.msra.mxu2 %v678_v17 }
 0x140   : > { %v586_v19 = vadd.f32 1e-05, %v584_v18  ;;  %v679_v18 = vld [vmem:[#allocation7 + $0x88] sm:$0xff] }
 0x141   : > { %766 = vmatpush.msra.mxu3 %v679_v18 }
 0x142   : > { %2576 = vrsqrt.f32 %v586_v19  ;;  %vm603_vm2 = vweird.f32 %v586_v19 }
 0x145   : > { %v580_v20 = vpop.xlane.xlu1 %579 }
 0x146   : > { %v583_v21 = vmul.f32 %v580_v20, %v3207_v8 }
 0x148   : > { %v2577_v22 = vpop.eup %2576  ;;  %v3217_v23 = vadd.f32 1e-05, %v583_v21  ;;  %v2961_v21 = vmov 0.0  }
 0x149   : > { %v598_v24 = vmul.f32 %v2577_v22, %v586_v19  ;;  %vm604_vm1 = vweird.f32 %v2577_v22  ;;  %v674_v19 = vld [vmem:[#allocation7 + $0x60] sm:$0xff] }
 0x14a   : > { %2578 = vrsqrt.f32 %v3217_v23  ;;  %vm605_vm3 = vmor %vm603_vm2, %vm604_vm1  ;;  %vm593_vm5 = vweird.f32 %v3217_v23  ;;  %721 = vmatpush.msra.mxu1 %v674_v19 }
 0x14b   : > { %v599_v25 = vmul.f32 %v2577_v22, %v598_v24  ;;  %v676_v24 = vld [vmem:[#allocation7 + $0x70] sm:$0xff] }
 0x14c   : > { %767 = vmatpush.msra.mxu3 %v676_v24 }
 0x14d   : > { %v600_v32 = vmul.f32 0.5, %v599_v25  ;;  %v671_v25 = vld [vmem:[#allocation7 + $0x48] sm:$0xff] }
 0x14e   : > { %722 = vmatpush.msra.mxu1 %v671_v25  ;;  %768 = vmatpush.msra.mxu3 %v673_v27 }
 0x14f   : > { %v601_v36 = vsub.f32 1.5, %v600_v32  ;;  %v666_v32 = vld [vmem:[#allocation7 + $0x20] sm:$0xff] }
 0x150   : > { %v2579_v39 = vpop.eup %2578  ;;  %723 = vmatpush.msra.mxu1 %v668_v28  ;;  %769 = vmatpush.msra.mxu3 %v670_v30 }
 0x151   : > { %v602_v41 = vmul.f32 %v2577_v22, %v601_v36  ;;  %v588_v42 = vmul.f32 %v2579_v39, %v3217_v23  ;;  %vm594_vm4 = vweird.f32 %v2579_v39  ;;  %v621_v23 = vadd.s32 8, %v620_v3  ;;  %v663_v36 = vld [vmem:[#allocation7 + $0x8] sm:$0xff] }
 0x152   : > { %vm595_vm6 = vmor %vm593_vm5, %vm594_vm4  ;;  %724 = vmatpush.msra.mxu1 %v665_v31  ;;  %770 = vmatpush.msra.mxu3 %v667_v33 }
 0x153   : > { %v589_v48 = vmul.f32 %v2579_v39, %v588_v42  ;;  %v606_v49 = vsel %vm605_vm3, %v2577_v22, %v602_v41  ;;  %v627_v22 = vsel %vm625_vm7, 1.0, %v2961_v21  ;;  %vm626_vm9 = vcmp.eq.s32.totalorder %v621_v23, %v624_v4 }
 0x154   : > { %v608_v52 = vmul.f32 %v606_v49, %v576_v11  ;;  %v628_v34 = vsel %vm626_vm9, 1.0, %v2961_v21  ;;  %725 = vmatpush.msra.mxu1 %v662_v35  ;;  %771 = vmatpush.msra.mxu3 %v664_v37 }
 0x155   : > { %v590_v55 = vmul.f32 0.5, %v589_v48 }
 0x156   : > { %v613_v59 = vmul.f32 %v2568_v46, %v608_v52 }
 0x157   : > { %v591_v61 = vsub.f32 1.5, %v590_v55 }
 0x158   : > { %v3227_v63 = vadd.f32 %v2569_v53, %v613_v59 }
 0x159   : > { %v592_v2 = vmul.f32 %v2579_v39, %v591_v61 }
 0x15a   : > { %650 = vmatpush.msra.mxu0 %v3227_v63 }
 0x15b   : > { %v596_v9 = vsel %vm595_vm6, %v2579_v39, %v592_v2 }
 0x15c   : > { %v607_v11 = vmul.f32 %v596_v9, %v3211_v15  ;;  %v675_v15 = vld [vmem:[#allocation7 + $0x68] sm:$0xff] }
 0x15d   : > { %744 = vmatpush.msra.mxu2 %v675_v15 }
 0x15e   : > { %v612_v16 = vmul.f32 %v2568_v46, %v607_v11 }
 0x15f   : > { %745 = vmatpush.msra.mxu2 %v672_v26 }
 0x160   : > { %v617_v20 = vadd.f32 %v2569_v53, %v612_v16 }
 0x161   : > { %746 = vmatpush.msra.mxu2 %v669_v29 }
 0x162   : > { %651 = vmatpush.msra.mxu0 %v617_v20 }
 0x163   : > { %2332 = vmatmul.msk.f32.vlgmr.msra.gmra.mxu0 %vm629_vm8, %v627_v22  ;;  %747 = vmatpush.msra.mxu2 %v666_v32  ;;  %v862_v32 = vld [vmem:[#allocation8] sm:$0xff] }
 0x165   : > { %748 = vmatpush.msra.mxu2 %v663_v36 }
 0x16b   : > { %2333 = vmatmul.msk.f32.gmra.mxu0 %vm629_vm8, %v628_v34 }
 0x1e0   : > { %v653_v38 = vpop.f32.mrf.mxu0 }
 0x1e1   : > { %v660_v39 = vsel %vm659_vm10, %v653_v38, %v617_v20 }
 0x1e2   : > { %726 = vmatmul.f32.vlgmr.msra.gmra.mxu1 %v660_v39  ;;  %749 = vmatmul.f32.vlgmr.msra.gmra.mxu2 %v660_v39 }
 0x1e3   : > { %772 = vmatmul.f32.vlgmr.msra.gmra.mxu3 %v660_v39 }
 0x1e8   : > { %v656_v40 = vpop.f32.mrf.mxu0 }
 0x1e9   : > { %v661_v41 = vsel %vm659_vm10, %v656_v40, %v3227_v63 }
 0x1ea   : > { %729 = vmatmul.f32.gmra.mxu1 %v661_v41  ;;  %752 = vmatmul.f32.gmra.mxu2 %v661_v41 }
 0x1eb   : > { %775 = vmatmul.f32.gmra.mxu3 %v661_v41 }
 0x25f   : > { %v3237_v42 = vpop.f32.mrf.mxu1 }
 0x260   : > { %895 = vrot.lane.b32.xlu1 %v3237_v42, %s2962_s16 }
 0x265   : > { %v3241_v43 = vpop.f32.mrf.mxu2 }
 0x266   : > { %899 = vrot.lane.b32.xlu0 %v3241_v43, %s2962_s16  ;;  %v3245_v44 = vpop.f32.mrf.mxu3 }
 0x267   : > { %v3267_v47 = vpop.f32.mrf.mxu1 }
 0x26d   : > { %v3247_v45 = vpop.f32.mrf.mxu2 }
 0x26e   : > { %1030 = vrot.lane.b32.xlu1 %v3247_v45, %s2963_s30  ;;  %1157 = vrot.lane.b32.xlu0 %v3247_v45, %s2964_s4  ;;  %v3255_v46 = vpop.f32.mrf.mxu3 }
 0x26f   : > { %2334 = vmatpush.xpose.msk.msrb.mxu0 %vm629_vm8, %v3247_v45 }
 0x273   : > { %2335 = vmatpush.xpose.msk.msrb.mxu0 %vm629_vm8, %v3241_v43 }
 0x276   : > { %2336 = vmatmul.msk.f32.vlgmr.msrb.gmra.mxu0 %vm629_vm8, %v3237_v42  ;;  %1024 = vrot.lane.b32.xlu1 %v3237_v42, %s2963_s30 }
 0x277   : > { %886 = vmatpush.msra.mxu0 %v3255_v46  ;;  %1151 = vrot.lane.b32.xlu0 %v3237_v42, %s2964_s4 }
 0x279   : > { %887 = vmatpush.msra.mxu0 %v3245_v44 }
 0x27e   : > { %2337 = vmatmul.msk.f32.gmra.mxu0 %vm629_vm8, %v3267_v47  ;;  %1411 = vrot.lane.b32.xlu1 %v3247_v45, %s2965_s17 }
 0x27f   : > { %1153 = vrot.lane.b32.xlu0 %v3267_v47, %s2964_s4 }
 0x286   : > { %1409 = vrot.lane.b32.xlu1 %v3241_v43, %s2965_s17 }
 0x287   : > { %1282 = vrot.lane.b32.xlu0 %v3241_v43, %s2966_s29 }
 0x28f   : > { %1278 = vrot.lane.b32.xlu0 %v3237_v42, %s2966_s29 }
 0x2d2   : > { %v896_v48 = vpop.permute.xlu1 %895 }
 0x2d8   : > { %v900_v57 = vpop.permute.xlu0 %899 }
 0x2e0   : > { %v1031_v49 = vpop.permute.xlu1 %1030  ;;  %v1158_v63 = vpop.permute.xlu0 %1157 }
 0x2e1   : > { %2346 = vmatpush.xpose.msk.msrb.mxu0 %vm629_vm8, %v1031_v49 }
 0x2e8   : > { %v3308_v1 = vpop.permute.xlu1 %1024 }
 0x2e9   : > { %v1152_v5 = vpop.permute.xlu0 %1151 }
 0x2f0   : > { %v1412_v6 = vpop.permute.xlu1 %1411 }
 0x2f1   : > { %v1154_v9 = vpop.permute.xlu0 %1153 }
 0x2f3   : > { %v808_v50 = vpop.f32.mrf.mxu0 }
 0x2f4   : > { %v814_v51 = vsel %vm629_vm8, %v808_v50, -inf }
 0x2f5   : > { %815 = vmax.xlane.f32.xlu2 %v814_v51 }
 0x2f8   : > { %v1410_v10 = vpop.permute.xlu1 %1409 }
 0x2f9   : > { %v1283_v12 = vpop.permute.xlu0 %1282 }
 0x2fb   : > { %v811_v52 = vpop.f32.mrf.mxu0 }
 0x2fc   : > { %v817_v53 = vsel %vm629_vm8, %v811_v52, -inf }
 0x2fd   : > { %818 = vmax.xlane.f32.xlu2 %v817_v53 }
 0x301   : > { %v1279_v14 = vpop.permute.xlu0 %1278 }
 0x315   : > { %901 = vrot.lane.b32.xlu2 %v3247_v45, %s2962_s16 }
 0x31d   : > { %897 = vrot.lane.b32.xlu2 %v3267_v47, %s2962_s16 }
 0x325   : > { %1155 = vrot.lane.b32.xlu2 %v3241_v43, %s2964_s4 }
 0x32d   : > { %1028 = vrot.lane.b32.xlu2 %v3241_v43, %s2963_s30 }
 0x335   : > { %1284 = vrot.lane.b32.xlu2 %v3247_v45, %s2966_s29 }
 0x33d   : > { %1026 = vrot.lane.b32.xlu2 %v3267_v47, %s2963_s30 }
 0x345   : > { %1405 = vrot.lane.b32.xlu2 %v3237_v42, %s2965_s17 }
 0x34d   : > { %1538 = vrot.lane.b32.xlu2 %v3247_v45, %s2967_s14 }
 0x355   : > { %1663 = vrot.lane.b32.xlu2 %v3241_v43, %s2968_s24 }
 0x35d   : > { %1534 = vrot.lane.b32.xlu2 %v3267_v47, %s2967_s14 }
 0x368   : > { %v816_v54 = vpop.xlane.xlu2 %815 }
 0x369   : > { %v820_v55 = vsub.f32 %v808_v50, %v816_v54 }
 0x36b   : > { %v822_v56 = vmul.f32 1.442695, %v820_v55 }
 0x36d   : > { %2580 = vpow2.f32 %v822_v56 }
 0x370   : > { %v819_v58 = vpop.xlane.xlu2 %818 }
 0x371   : > { %v821_v59 = vsub.f32 %v811_v52, %v819_v58 }
 0x373   : > { %v3304_v60 = vpop.eup %2580  ;;  %v824_v61 = vmul.f32 1.442695, %v821_v59 }
 0x374   : > { %v826_v62 = vsel %vm629_vm8, %v3304_v60, 0.0 }
 0x375   : > { %2582 = vpow2.f32 %v824_v61  ;;  %827 = vadd.xlane.f32.xlu0 %v826_v62 }
 0x378   : > { %v902_v0 = vpop.permute.xlu2 %901 }
 0x379   : > { %2340 = vmatpush.xpose.msk.msrb.mxu1 %vm629_vm8, %v902_v0 }
 0x37b   : > { %v3311_v2 = vpop.eup %2582 }
 0x37c   : > { %v829_v3 = vsel %vm629_vm8, %v3311_v2, 0.0 }
 0x37d   : > { %830 = vadd.xlane.f32.xlu1 %v829_v3  ;;  %2341 = vmatpush.xpose.msk.msrb.mxu1 %vm629_vm8, %v900_v57 }
 0x380   : > { %2342 = vmatmul.msk.f32.vlgmr.msrb.gmra.mxu1 %vm629_vm8, %v896_v48  ;;  %v898_v4 = vpop.permute.xlu2 %897  ;;  %v863_v48 = vld [vmem:[#allocation8 + $0x8] sm:$0xff] }
 0x381   : > { %2352 = vmatpush.xpose.msk.msra.mxu1 %vm629_vm8, %v1158_v63 }
 0x388   : > { %2343 = vmatmul.msk.f32.gmra.mxu1 %vm629_vm8, %v898_v4  ;;  %v1156_v7 = vpop.permute.xlu2 %1155 }
 0x389   : > { %1407 = vrot.lane.b32.xlu0 %v3267_v47, %s2965_s17  ;;  %2353 = vmatpush.xpose.msk.msra.mxu1 %vm629_vm8, %v1156_v7 }
 0x38d   : > { %2364 = vmatpush.xpose.msk.msrb.mxu1 %vm629_vm8, %v1412_v6 }
 0x390   : > { %2354 = vmatmul.msk.f32.vlgmr.msra.gmra.mxu1 %vm629_vm8, %v1152_v5  ;;  %v1029_v11 = vpop.permute.xlu2 %1028 }
 0x391   : > { %2365 = vmatpush.xpose.msk.msrb.mxu1 %vm629_vm8, %v1410_v10  ;;  %1536 = vrot.lane.b32.xlu0 %v3241_v43, %s2967_s14 }
 0x392   : > { %2347 = vmatpush.xpose.msk.msrb.mxu0 %vm629_vm8, %v1029_v11 }
 0x396   : > { %1280 = vrot.lane.b32.xlu1 %v3267_v47, %s2966_s29 }
 0x398   : > { %2355 = vmatmul.msk.f32.gmra.mxu1 %vm629_vm8, %v1154_v9  ;;  %v1285_v13 = vpop.permute.xlu2 %1284 }
 0x399   : > { %1659 = vrot.lane.b32.xlu0 %v3237_v42, %s2968_s24  ;;  %2358 = vmatpush.xpose.msk.msrb.mxu3 %vm629_vm8, %v1285_v13 }
 0x39d   : > { %2359 = vmatpush.xpose.msk.msrb.mxu3 %vm629_vm8, %v1283_v12 }
 0x39e   : > { %1665 = vrot.lane.b32.xlu1 %v3247_v45, %s2968_s24 }
 0x3a0   : > { %2360 = vmatmul.msk.f32.vlgmr.msrb.gmra.mxu3 %vm629_vm8, %v1279_v14  ;;  %v3338_v16 = vpop.permute.xlu2 %1026 }
 0x3a6   : > { %1532 = vrot.lane.b32.xlu1 %v3237_v42, %s2967_s14 }
 0x3a8   : > { %v1406_v17 = vpop.permute.xlu2 %1405 }
 0x3a9   : > { %2366 = vmatmul.msk.f32.vlgmr.msrb.gmra.mxu1 %vm629_vm8, %v1406_v17 }
 0x3ae   : > { %1661 = vrot.lane.b32.xlu1 %v3267_v47, %s2968_s24 }
 0x3b0   : > { %v1539_v18 = vpop.permute.xlu2 %1538 }
 0x3b1   : > { %2370 = vmatpush.xpose.msk.msra.mxu3 %vm629_vm8, %v1539_v18 }
 0x3b8   : > { %v1664_v58 = vpop.permute.xlu2 %1663 }
 0x3c0   : > { %v1535_v61 = vpop.permute.xlu2 %1534 }
 0x3e8   : > { %v828_v19 = vpop.xlane.xlu0 %827 }
 0x3e9   : > { %2584 = vrcp.f32 %v828_v19  ;;  %v843_v23 = vand.u32 2147483648, %v828_v19  ;;  %v841_v25 = vand.u32 2147483647, %v828_v19  ;;  %vm837_vm12 = vweird.f32 %v828_v19 }
 0x3eb   : > { %v844_v28 = vor.u32 1.1754944e-38, %v843_v23  ;;  %vm842_vm14 = vcmp.eq.f32.partialorder %v841_v25, 8.507059e+37 }
 0x3ef   : > { %v2585_v20 = vpop.eup %2584 }
 0x3f0   : > { %v833_v21 = vmul.f32 %v2585_v20, %v828_v19  ;;  %v831_v22 = vpop.xlane.xlu1 %830  ;;  %vm838_vm11 = vweird.f32 %v2585_v20 }
 0x3f1   : > { %2586 = vrcp.f32 %v831_v22  ;;  %vm839_vm13 = vmor %vm837_vm12, %vm838_vm11  ;;  %v858_v35 = vand.u32 2147483648, %v831_v22  ;;  %v856_v38 = vand.u32 2147483647, %v831_v22  ;;  %vm852_vm0 = vweird.f32 %v831_v22 }
 0x3f2   : > { %v834_v15 = vsub.f32 1.0, %v833_v21 }
 0x3f3   : > { %v859_v43 = vor.u32 1.1754944e-38, %v858_v35  ;;  %vm857_vm2 = vcmp.eq.f32.partialorder %v856_v38, 8.507059e+37 }
 0x3f4   : > { %v835_v24 = vmul.f32 %v2585_v20, %v834_v15 }
 0x3f6   : > { %v836_v26 = vadd.f32 %v2585_v20, %v835_v24 }
 0x3f7   : > { %v2587_v27 = vpop.eup %2586 }
 0x3f8   : > { %v840_v29 = vsel %vm839_vm13, %v2585_v20, %v836_v26  ;;  %v848_v30 = vmul.f32 %v2587_v27, %v831_v22  ;;  %vm853_vm15 = vweird.f32 %v2587_v27 }
 0x3f9   : > { %v845_v31 = vsel %vm842_vm14, %v844_v28, %v840_v29  ;;  %vm854_vm1 = vmor %vm852_vm0, %vm853_vm15 }
 0x3fa   : > { %v846_v33 = vmul.f32 %v3304_v60, %v845_v31  ;;  %v849_v34 = vsub.f32 1.0, %v848_v30 }
 0x3fb   : > { %v1408_v36 = vpop.permute.xlu0 %1407 }
 0x3fc   : > { %v850_v37 = vmul.f32 %v2587_v27, %v849_v34  ;;  %2367 = vmatmul.msk.f32.gmra.mxu1 %vm629_vm8, %v1408_v36  ;;  %v864_v39 = vmul.f32 %v862_v32, %v846_v33 }
 0x3fd   : > { %v928_v40 = vpop.f32.mrf.mxu1 }
 0x3fe   : > { %v851_v41 = vadd.f32 %v2587_v27, %v850_v37  ;;  %2338 = vmatmul.msk.f32.vlgmr.msra.gmra.mxu0 %vm629_vm8, %v864_v39  ;;  %v934_v42 = vsel %vm629_vm8, %v928_v40, -inf }
 0x3ff   : > { %935 = vmax.xlane.f32.xlu0 %v934_v42 }
 0x400   : > { %v855_v45 = vsel %vm854_vm1, %v2587_v27, %v851_v41 }
 0x401   : > { %v860_v47 = vsel %vm857_vm2, %v859_v43, %v855_v45 }
 0x402   : > { %v861_v49 = vmul.f32 %v3311_v2, %v860_v47 }
 0x403   : > { %v1537_v50 = vpop.permute.xlu0 %1536 }
 0x404   : > { %2371 = vmatpush.xpose.msk.msra.mxu3 %vm629_vm8, %v1537_v50  ;;  %v865_v51 = vmul.f32 %v863_v48, %v861_v49 }
 0x405   : > { %v931_v52 = vpop.f32.mrf.mxu1 }
 0x406   : > { %2339 = vmatmul.msk.f32.gmra.mxu0 %vm629_vm8, %v865_v51  ;;  %v937_v53 = vsel %vm629_vm8, %v931_v52, -inf }
 0x407   : > { %938 = vmax.xlane.f32.xlu2 %v937_v53 }
 0x408   : > { %v1281_v54 = vpop.permute.xlu1 %1280 }
 0x409   : > { %2361 = vmatmul.msk.f32.gmra.mxu3 %vm629_vm8, %v1281_v54 }
 0x40b   : > { %v1660_v59 = vpop.permute.xlu0 %1659 }
 0x40d   : > { %v3355_v55 = vpop.f32.mrf.mxu1 }
 0x40e   : > { %2348 = vmatmul.msk.f32.vlgmr.msrb.gmra.mxu0 %vm629_vm8, %v3308_v1  ;;  %v1190_v56 = vsel %vm629_vm8, %v3355_v55, -inf  ;;  %v3372_v1 = vpack.i.bf16 %v3245_v44, %v3255_v46 }
 0x40f   : > { %1191 = vmax.xlane.f32.xlu1 %v1190_v56 }
 0x410   : > { %v1666_v57 = vpop.permute.xlu1 %1665 }
 0x411   : > { %2376 = vmatpush.xpose.msk.msra.mxu1 %vm629_vm8, %v1666_v57 }
 0x415   : > { %2377 = vmatpush.xpose.msk.msra.mxu1 %vm629_vm8, %v1664_v58  ;;  %v1187_v2 = vpop.f32.mrf.mxu1 }
 0x416   : > { %2349 = vmatmul.msk.f32.gmra.mxu0 %vm629_vm8, %v3338_v16  ;;  %v1193_v3 = vsel %vm629_vm8, %v1187_v2, -inf }
 0x418   : > { %v1533_v60 = vpop.permute.xlu1 %1532  ;;  %2378 = vmatmul.msk.f32.vlgmr.msra.gmra.mxu1 %vm629_vm8, %v1660_v59 }
 0x419   : > { %2372 = vmatmul.msk.f32.vlgmr.msra.gmra.mxu3 %vm629_vm8, %v1533_v60 }
 0x420   : > { %v1662_v62 = vpop.permute.xlu1 %1661 }
 0x421   : > { %2373 = vmatmul.msk.f32.gmra.mxu3 %vm629_vm8, %v1535_v61  ;;  %2379 = vmatmul.msk.f32.gmra.mxu1 %vm629_vm8, %v1662_v62 }
 0x423   : > { %v1311_v63 = vpop.f32.mrf.mxu3 }
 0x424   : > { %v1317_v0 = vsel %vm629_vm8, %v1311_v63, -inf }
 0x425   : > { %1318 = vmax.xlane.f32.xlu2 %v1317_v0 }
 0x426   : > { %v3377_v4 = vpop.f32.mrf.mxu1 }
 0x427   : > { %v1444_v51 = vsel %vm629_vm8, %v3377_v4, -inf }
 0x428   : > { %2514 = vrot.lane.b32.xlu1 %v3372_v1, %s2962_s16 }
 0x42d   : > { %1194 = vmax.xlane.f32.xlu2 %v1193_v3 }
 0x472   : > { %v936_v5 = vpop.xlane.xlu0 %935 }
 0x473   : > { %v940_v6 = vsub.f32 %v928_v40, %v936_v5 }
 0x475   : > { %v942_v7 = vmul.f32 1.442695, %v940_v6 }
 0x477   : > { %2588 = vpow2.f32 %v942_v7 }
 0x479   : > { %v3379_v9 = vpop.f32.mrf.mxu1 }
 0x47a   : > { %v939_v10 = vpop.xlane.xlu2 %938  ;;  %v1447_v44 = vsel %vm629_vm8, %v3379_v9, -inf }
 0x47b   : > { %v941_v46 = vsub.f32 %v931_v52, %v939_v10  ;;  %v3383_v11 = vpop.f32.mrf.mxu0  ;;  %1448 = vmax.xlane.f32.xlu1 %v1447_v44  ;;  %v983_v44 = vld [vmem:[#allocation8 + $0x10] sm:$0xff] }
 0x47d   : > { %v944_v12 = vmul.f32 1.442695, %v941_v46  ;;  %v3385_v13 = vpop.eup %2588 }
 0x47e   : > { %v946_v14 = vsel %vm629_vm8, %v3385_v13, 0.0 }
 0x47f   : > { %2590 = vpow2.f32 %v944_v12 }
 0x482   : > { %v1192_v22 = vpop.xlane.xlu1 %1191 }
 0x483   : > { %v3389_v16 = vpop.f32.mrf.mxu0  ;;  %947 = vadd.xlane.f32.xlu1 %v946_v14  ;;  %v1196_v32 = vsub.f32 %v3355_v55, %v1192_v22 }
 0x485   : > { %v3391_v17 = vpop.eup %2590  ;;  %v1198_v35 = vmul.f32 1.442695, %v1196_v32 }
 0x486   : > { %v949_v18 = vsel %vm629_vm8, %v3391_v17, 0.0 }
 0x48b   : > { %v3395_v19 = vpop.f32.mrf.mxu0  ;;  %950 = vadd.xlane.f32.xlu1 %v949_v18 }
 0x48c   : > { %v3397_v20 = vpop.f32.mrf.mxu3  ;;  %v1063_v52 = vsel %vm629_vm8, %v3395_v19, -inf }
 0x48d   : > { %v1320_v21 = vsel %vm629_vm8, %v3397_v20, -inf }
 0x48e   : > { %1321 = vmax.xlane.f32.xlu0 %v1320_v21 }
 0x493   : > { %v3401_v15 = vpop.f32.mrf.mxu0 }
 0x494   : > { %v1066_v23 = vsel %vm629_vm8, %v3401_v15, -inf }
 0x495   : > { %v3405_v24 = vpop.f32.mrf.mxu1  ;;  %1067 = vmax.xlane.f32.xlu1 %v1066_v23 }
 0x496   : > { %v1698_v25 = vsel %vm629_vm8, %v3405_v24, -inf }
 0x497   : > { %1699 = vmax.xlane.f32.xlu2 %v1698_v25 }
 0x498   : > { %v1319_v26 = vpop.xlane.xlu2 %1318 }
 0x499   : > { %v1323_v27 = vsub.f32 %v1311_v63, %v1319_v26 }
 0x49a   : > { %v2515_v28 = vpop.permute.xlu1 %2514 }
 0x49b   : > { %v1325_v29 = vmul.f32 1.442695, %v1323_v27  ;;  %v2516_v30 = vunpack.i.l.bf16 %v2515_v28  ;;  %v2517_v31 = vunpack.i.h.bf16 %v2515_v28 }
 0x49c   : > { %v3430_v47 = vpop.f32.mrf.mxu3 }
 0x49d   : > { %1015 = vmatpush.msrb.mxu2 %v2516_v30  ;;  %2592 = vpow2.f32 %v1325_v29  ;;  %v1571_v48 = vsel %vm629_vm8, %v3430_v47, -inf  ;;  %v984_v29 = vld [vmem:[#allocation8 + $0x18] sm:$0xff] }
 0x49e   : > { %v3410_v33 = vpop.f32.mrf.mxu1  ;;  %2594 = vpow2.f32 %v1198_v35 }
 0x49f   : > { %1016 = vmatpush.msrb.mxu2 %v2517_v31  ;;  %v1701_v34 = vsel %vm629_vm8, %v3410_v33, -inf }
 0x4a0   : > { %1702 = vmax.xlane.f32.xlu2 %v1701_v34  ;;  %v1195_v36 = vpop.xlane.xlu2 %1194 }
 0x4a1   : > { %v1197_v38 = vsub.f32 %v1187_v2, %v1195_v36 }
 0x4a2   : > { %2519 = vrot.lane.b32.xlu0 %v3372_v1, %s2964_s4 }
 0x4a3   : > { %v3416_v37 = vpop.eup %2592  ;;  %v1200_v40 = vmul.f32 1.442695, %v1197_v38 }
 0x4a4   : > { %v1329_v39 = vsel %vm629_vm8, %v3416_v37, 0.0  ;;  %v3420_v41 = vpop.eup %2594  ;;  %v3434_v49 = vpop.f32.mrf.mxu3 }
 0x4a5   : > { %2596 = vpow2.f32 %v1200_v40  ;;  %v1202_v42 = vsel %vm629_vm8, %v3420_v41, 0.0  ;;  %v1574_v50 = vsel %vm629_vm8, %v3434_v49, -inf }
 0x4a8   : > { %1330 = vadd.xlane.f32.xlu2 %v1329_v39 }
 0x4ab   : > { %v3426_v43 = vpop.eup %2596 }
 0x4ac   : > { %v1205_v45 = vsel %vm629_vm8, %v3426_v43, 0.0 }
 0x4ae   : > { %2524 = vrot.lane.b32.xlu1 %v3372_v1, %s2963_s30 }
 0x4b0   : > { %1203 = vadd.xlane.f32.xlu2 %v1202_v42 }
 0x4b8   : > { %1206 = vadd.xlane.f32.xlu2 %v1205_v45 }
 0x4cc   : > { %1572 = vmax.xlane.f32.xlu0 %v1571_v48 }
 0x4d4   : > { %1575 = vmax.xlane.f32.xlu0 %v1574_v50 }
 0x4dc   : > { %1445 = vmax.xlane.f32.xlu0 %v1444_v51 }
 0x4e4   : > { %1064 = vmax.xlane.f32.xlu0 %v1063_v52 }
 0x4ee   : > { %v3442_v53 = vpop.xlane.xlu1 %1448 }
 0x4f6   : > { %v948_v54 = vpop.xlane.xlu1 %947 }
 0x4f7   : > { %2598 = vrcp.f32 %v948_v54  ;;  %v963_v59 = vand.u32 2147483648, %v948_v54  ;;  %v961_v62 = vand.u32 2147483647, %v948_v54  ;;  %vm957_vm4 = vweird.f32 %v948_v54 }
 0x4f8   : > { %2529 = vrot.lane.b32.xlu0 %v3372_v1, %s2965_s17 }
 0x4f9   : > { %v964_v5 = vor.u32 1.1754944e-38, %v963_v59  ;;  %vm962_vm6 = vcmp.eq.f32.partialorder %v961_v62, 8.507059e+37 }
 0x4fd   : > { %v2599_v55 = vpop.eup %2598 }
 0x4fe   : > { %v953_v56 = vmul.f32 %v2599_v55, %v948_v54  ;;  %v951_v57 = vpop.xlane.xlu1 %950  ;;  %vm958_vm3 = vweird.f32 %v2599_v55 }
 0x4ff   : > { %2600 = vrcp.f32 %v951_v57  ;;  %vm959_vm5 = vmor %vm957_vm4, %vm958_vm3  ;;  %v978_v14 = vand.u32 2147483648, %v951_v57  ;;  %v976_v21 = vand.u32 2147483647, %v951_v57  ;;  %vm972_vm9 = vweird.f32 %v951_v57 }
 0x500   : > { %v954_v58 = vsub.f32 1.0, %v953_v56 }
 0x501   : > { %v1322_v60 = vpop.xlane.xlu0 %1321  ;;  %v979_v26 = vor.u32 1.1754944e-38, %v978_v14  ;;  %vm977_vm11 = vcmp.eq.f32.partialorder %v976_v21, 8.507059e+37  ;;  %v1240_v14 = vld [vmem:[#allocation8 + $0x38] sm:$0xff] }
 0x502   : > { %v955_v61 = vmul.f32 %v2599_v55, %v954_v58  ;;  %v1324_v63 = vsub.f32 %v3397_v20, %v1322_v60 }
 0x504   : > { %v956_v0 = vadd.f32 %v2599_v55, %v955_v61  ;;  %v1327_v2 = vmul.f32 1.442695, %v1324_v63  ;;  %v1239_v63 = vld [vmem:[#allocation8 + $0x30] sm:$0xff] }
 0x505   : > { %v2601_v3 = vpop.eup %2600 }
 0x506   : > { %v960_v6 = vsel %vm959_vm5, %v2599_v55, %v956_v0  ;;  %v968_v7 = vmul.f32 %v2601_v3, %v951_v57  ;;  %2602 = vpow2.f32 %v1327_v2  ;;  %vm973_vm7 = vweird.f32 %v2601_v3 }
 0x507   : > { %v965_v10 = vsel %vm962_vm6, %v964_v5, %v960_v6  ;;  %vm974_vm10 = vmor %vm972_vm9, %vm973_vm7 }
 0x508   : > { %v969_v46 = vsub.f32 1.0, %v968_v7  ;;  %v966_v12 = vmul.f32 %v3385_v13, %v965_v10  ;;  %v3459_v38 = vpop.xlane.xlu1 %1067 }
 0x50a   : > { %v970_v18 = vmul.f32 %v2601_v3, %v969_v46  ;;  %v3448_v20 = vpop.xlane.xlu2 %1699  ;;  %v985_v22 = vmul.f32 %v983_v44, %v966_v12 }
 0x50c   : > { %v3450_v23 = vpop.eup %2602  ;;  %v971_v25 = vadd.f32 %v2601_v3, %v970_v18  ;;  %2344 = vmatmul.msk.f32.vlgmr.msrb.gmra.mxu2 %vm629_vm8, %v985_v22 }
 0x50d   : > { %v1332_v27 = vsel %vm629_vm8, %v3450_v23, 0.0 }
 0x50e   : > { %1333 = vadd.xlane.f32.xlu1 %v1332_v27  ;;  %v975_v13 = vsel %vm974_vm10, %v2601_v3, %v971_v25  ;;  %v1451_v27 = vsub.f32 %v3379_v9, %v3442_v53 }
 0x50f   : > { %v980_v28 = vsel %vm977_vm11, %v979_v26, %v975_v13 }
 0x510   : > { %v981_v30 = vmul.f32 %v3391_v17, %v980_v28  ;;  %v1454_v28 = vmul.f32 1.442695, %v1451_v27 }
 0x512   : > { %v986_v31 = vmul.f32 %v984_v29, %v981_v30 }
 0x513   : > { %v3456_v32 = vpop.xlane.xlu2 %1702 }
 0x514   : > { %v2520_v34 = vpop.permute.xlu0 %2519  ;;  %2345 = vmatmul.msk.f32.gmra.mxu2 %vm629_vm8, %v986_v31 }
 0x515   : > { %v2521_v35 = vunpack.i.l.bf16 %v2520_v34  ;;  %v2522_v36 = vunpack.i.h.bf16 %v2520_v34  ;;  %v1704_v34 = vsub.f32 %v3405_v24, %v3448_v20 }
 0x517   : > { %1269 = vmatpush.msra.mxu2 %v2521_v35  ;;  %v1706_v53 = vmul.f32 1.442695, %v1704_v34 }
 0x519   : > { %1270 = vmatpush.msra.mxu2 %v2522_v36 }
 0x51b   : > { %v3461_v39 = vpop.xlane.xlu2 %1330 }
 0x51c   : > { %vm1340_vm11 = vweird.f32 %v3461_v39 }
 0x520   : > { %v2525_v40 = vpop.permute.xlu1 %2524 }
 0x521   : > { %v2526_v42 = vunpack.i.l.bf16 %v2525_v40  ;;  %v2527_v45 = vunpack.i.h.bf16 %v2525_v40 }
 0x523   : > { %1142 = vmatpush.msra.mxu0 %v2526_v42  ;;  %v1204_v48 = vpop.xlane.xlu2 %1203 }
 0x524   : > { %2604 = vrcp.f32 %v1204_v48  ;;  %v1219_v54 = vand.u32 2147483648, %v1204_v48  ;;  %v1217_v56 = vand.u32 2147483647, %v1204_v48  ;;  %vm1213_vm13 = vweird.f32 %v1204_v48 }
 0x525   : > { %1143 = vmatpush.msra.mxu0 %v2527_v45  ;;  %v1705_v45 = vsub.f32 %v3410_v33, %v3456_v32 }
 0x526   : > { %v1220_v59 = vor.u32 1.1754944e-38, %v1219_v54  ;;  %vm1218_vm15 = vcmp.eq.f32.partialorder %v1217_v56, 8.507059e+37 }
 0x527   : > { %2544 = vrot.lane.b32.xlu1 %v3372_v1, %s2967_s14 }
 0x52a   : > { %v2605_v17 = vpop.eup %2604 }
 0x52b   : > { %v1209_v50 = vmul.f32 %v2605_v17, %v1204_v48  ;;  %v1207_v51 = vpop.xlane.xlu2 %1206  ;;  %vm1214_vm12 = vweird.f32 %v2605_v17 }
 0x52c   : > { %2606 = vrcp.f32 %v1207_v51  ;;  %vm1215_vm14 = vmor %vm1213_vm13, %vm1214_vm12  ;;  %v1234_v3 = vand.u32 2147483648, %v1207_v51  ;;  %v1232_v6 = vand.u32 2147483647, %v1207_v51  ;;  %vm1228_vm1 = vweird.f32 %v1207_v51 }
 0x52d   : > { %v1210_v52 = vsub.f32 1.0, %v1209_v50 }
 0x52e   : > { %v1235_v44 = vor.u32 1.1754944e-38, %v1234_v3  ;;  %vm1233_vm3 = vcmp.eq.f32.partialorder %v1232_v6, 8.507059e+37 }
 0x52f   : > { %v1211_v55 = vmul.f32 %v2605_v17, %v1210_v52  ;;  %v1708_v52 = vmul.f32 1.442695, %v1705_v45 }
 0x531   : > { %v1212_v57 = vadd.f32 %v2605_v17, %v1211_v55 }
 0x532   : > { %v2607_v58 = vpop.eup %2606 }
 0x533   : > { %v1216_v60 = vsel %vm1215_vm14, %v2605_v17, %v1212_v57  ;;  %v1224_v61 = vmul.f32 %v2607_v58, %v1207_v51  ;;  %vm1229_vm0 = vweird.f32 %v2607_v58 }
 0x534   : > { %v1221_v62 = vsel %vm1218_vm15, %v1220_v59, %v1216_v60  ;;  %vm1230_vm2 = vmor %vm1228_vm1, %vm1229_vm0 }
 0x535   : > { %v1222_v0 = vmul.f32 %v3420_v41, %v1221_v62  ;;  %v1225_v2 = vsub.f32 1.0, %v1224_v61 }
 0x537   : > { %v1226_v5 = vmul.f32 %v2607_v58, %v1225_v2  ;;  %v1241_v7 = vmul.f32 %v1239_v63, %v1222_v0 }
 0x539   : > { %v1227_v10 = vadd.f32 %v2607_v58, %v1226_v5  ;;  %2356 = vmatmul.msk.f32.vlgmr.msra.gmra.mxu2 %vm629_vm8, %v1241_v7 }
 0x53b   : > { %v1231_v46 = vsel %vm1230_vm2, %v2607_v58, %v1227_v10 }
 0x53c   : > { %v1236_v12 = vsel %vm1233_vm3, %v1235_v44, %v1231_v46 }
 0x53d   : > { %v1237_v18 = vmul.f32 %v3426_v43, %v1236_v12  ;;  %v1070_v43 = vsub.f32 %v3401_v15, %v3459_v38 }
 0x53f   : > { %v1573_v21 = vpop.xlane.xlu0 %1572  ;;  %v1242_v41 = vmul.f32 %v1240_v14, %v1237_v18  ;;  %v1073_v9 = vmul.f32 1.442695, %v1070_v43 }
 0x540   : > { %v1577_v15 = vsub.f32 %v3430_v47, %v1573_v21 }
 0x541   : > { %2357 = vmatmul.msk.f32.gmra.mxu2 %vm629_vm8, %v1242_v41 }
 0x542   : > { %v1579_v20 = vmul.f32 1.442695, %v1577_v15 }
 0x547   : > { %v1576_v22 = vpop.xlane.xlu0 %1575 }
 0x548   : > { %v1578_v58 = vsub.f32 %v3434_v49, %v1576_v22 }
 0x54a   : > { %v1581_v60 = vmul.f32 1.442695, %v1578_v58 }
 0x54f   : > { %v1446_v25 = vpop.xlane.xlu0 %1445 }
 0x550   : > { %v1450_v26 = vsub.f32 %v3377_v4, %v1446_v25 }
 0x552   : > { %v1452_v13 = vmul.f32 1.442695, %v1450_v26 }
 0x554   : > { %2608 = vpow2.f32 %v1452_v13 }
 0x555   : > { %2610 = vpow2.f32 %v1454_v28 }
 0x557   : > { %v1065_v29 = vpop.xlane.xlu0 %1064 }
 0x558   : > { %v1069_v30 = vsub.f32 %v3395_v19, %v1065_v29 }
 0x55a   : > { %v3475_v31 = vpop.eup %2608  ;;  %v1071_v35 = vmul.f32 1.442695, %v1069_v30 }
 0x55b   : > { %v1456_v4 = vsel %vm629_vm8, %v3475_v31, 0.0  ;;  %v3481_v36 = vpop.eup %2610 }
 0x55c   : > { %2612 = vpow2.f32 %v1071_v35  ;;  %1457 = vadd.xlane.f32.xlu2 %v1456_v4  ;;  %v1459_v24 = vsel %vm629_vm8, %v3481_v36, 0.0  ;;  %v1493_v35 = vld [vmem:[#allocation8 + $0x50] sm:$0xff] }
 0x55d   : > { %2614 = vpow2.f32 %v1073_v9 }
 0x55e   : > { %2616 = vpow2.f32 %v1706_v53 }
 0x55f   : > { %2618 = vpow2.f32 %v1579_v20 }
 0x560   : > { %2620 = vpow2.f32 %v1708_v52 }
 0x561   : > { %2622 = vpow2.f32 %v1581_v60 }
 0x562   : > { %v3483_v19 = vpop.eup %2612 }
 0x563   : > { %v1075_v38 = vsel %vm629_vm8, %v3483_v19, 0.0  ;;  %v3490_v40 = vpop.eup %2614 }
 0x564   : > { %1076 = vadd.xlane.f32.xlu0 %v1075_v38  ;;  %1460 = vadd.xlane.f32.xlu2 %v1459_v24  ;;  %v3492_v42 = vpop.eup %2616  ;;  %v1078_v47 = vsel %vm629_vm8, %v3490_v40, 0.0 }
 0x565   : > { %v1710_v50 = vsel %vm629_vm8, %v3492_v42, 0.0  ;;  %v3500_v54 = vpop.eup %2618 }
 0x566   : > { %v1583_v33 = vsel %vm629_vm8, %v3500_v54, 0.0  ;;  %v3504_v32 = vpop.eup %2620 }
 0x567   : > { %v1713_v55 = vsel %vm629_vm8, %v3504_v32, 0.0  ;;  %v3514_v61 = vpop.eup %2622 }
 0x568   : > { %v1586_v62 = vsel %vm629_vm8, %v3514_v61, 0.0 }
 0x56a   : > { %v2530_v48 = vpop.permute.xlu0 %2529 }
 0x56b   : > { %v2531_v17 = vunpack.i.l.bf16 %v2530_v48  ;;  %v2532_v51 = vunpack.i.h.bf16 %v2530_v48 }
 0x56c   : > { %1079 = vadd.xlane.f32.xlu0 %v1078_v47  ;;  %1711 = vadd.xlane.f32.xlu2 %v1710_v50 }
 0x56d   : > { %1523 = vmatpush.msrb.mxu2 %v2531_v17  ;;  %v1344_v17 = vand.u32 2147483647, %v3461_v39 }
 0x56f   : > { %1524 = vmatpush.msrb.mxu2 %v2532_v51 }
 0x574   : > { %1584 = vadd.xlane.f32.xlu2 %v1583_v33 }
 0x57c   : > { %1714 = vadd.xlane.f32.xlu2 %v1713_v55 }
 0x580   : > { %2534 = vrot.lane.b32.xlu0 %v3372_v1, %s2966_s29 }
 0x581   : > { %v3525_v14 = vpop.xlane.xlu1 %1333 }
 0x58f   : > { %v1018_v56 = vpop.f32.mrf.mxu2 }
 0x594   : > { %2539 = vrot.lane.b32.xlu2 %v3372_v1, %s2968_s24 }
 0x597   : > { %v1021_v57 = vpop.f32.mrf.mxu2 }
 0x598   : > { %v2548_v59 = vpack.i.bf16 %v1021_v57, %v1018_v56 }
 0x59c   : > { %2549 = vrot.lane.b32.xlu2 %v2548_v59, %s2968_s24 }
 0x5aa   : > { %1587 = vadd.xlane.f32.xlu0 %v1586_v62 }
 0x5bc   : > { %v1272_v63 = vpop.f32.mrf.mxu2 }
 0x5c4   : > { %v1275_v0 = vpop.f32.mrf.mxu2 }
 0x5c5   : > { %v2553_v2 = vpack.i.bf16 %v1275_v0, %v1272_v63  ;;  %v1112_v0 = vld [vmem:[#allocation8 + $0x20] sm:$0xff] }
 0x5c7   : > { %2554 = vrot.lane.b32.xlu0 %v2553_v2, %s2965_s17  ;;  %s3798_s17 = sld [smem:[#allocation26_spill]] }
 0x5cf   : > { %v1458_v1 = vpop.xlane.xlu2 %1457 }
 0x5d0   : > { %2624 = vrcp.f32 %v1458_v1  ;;  %v1473_v10 = vand.u32 2147483648, %v1458_v1  ;;  %v1471_v12 = vand.u32 2147483647, %v1458_v1  ;;  %vm1467_vm5 = vweird.f32 %v1458_v1 }
 0x5d1   : > { %2626 = vrcp.f32 %v3461_v39 }
 0x5d2   : > { %v1474_v22 = vor.u32 1.1754944e-38, %v1473_v10  ;;  %vm1472_vm7 = vcmp.eq.f32.partialorder %v1471_v12, 8.507059e+37  ;;  %v1494_v12 = vld [vmem:[#allocation8 + $0x58] sm:$0xff] }
 0x5d6   : > { %v2625_v49 = vpop.eup %2624 }
 0x5d7   : > { %v1463_v3 = vmul.f32 %v2625_v49, %v1458_v1  ;;  %v1077_v5 = vpop.xlane.xlu0 %1076  ;;  %v3520_v6 = vpop.xlane.xlu2 %1460  ;;  %vm1468_vm4 = vweird.f32 %v2625_v49 }
 0x5d8   : > { %2628 = vrcp.f32 %v1077_v5  ;;  %v3523_v44 = vpop.eup %2626  ;;  %vm1469_vm6 = vmor %vm1467_vm5, %vm1468_vm4  ;;  %v1092_v4 = vand.u32 2147483648, %v1077_v5  ;;  %v1090_v38 = vand.u32 2147483647, %v1077_v5  ;;  %v1488_v20 = vand.u32 2147483648, %v3520_v6 }
 0x5d9   : > { %v1464_v7 = vsub.f32 1.0, %v1463_v3  ;;  %2630 = vrcp.f32 %v3520_v6  ;;  %v1336_v41 = vmul.f32 %v3523_v44, %v3461_v39  ;;  %vm1086_vm10 = vweird.f32 %v1077_v5 }
 0x5da   : > { %2632 = vrcp.f32 %v3525_v14  ;;  %v1093_v51 = vor.u32 1.1754944e-38, %v1092_v4  ;;  %v1486_v33 = vand.u32 2147483647, %v3520_v6  ;;  %vm1091_vm14 = vcmp.eq.f32.partialorder %v1090_v38, 8.507059e+37 }
 0x5db   : > { %v1465_v46 = vmul.f32 %v2625_v49, %v1464_v7  ;;  %v1337_v53 = vsub.f32 1.0, %v1336_v41  ;;  %vm1482_vm15 = vweird.f32 %v3520_v6  ;;  %v1489_v63 = vor.u32 1.1754944e-38, %v1488_v20 }
 0x5dc   : > { %vm1487_vm1 = vcmp.eq.f32.partialorder %v1486_v33, 8.507059e+37  ;;  %vm1341_vm3 = vweird.f32 %v3523_v44 }
 0x5dd   : > { %v1466_v18 = vadd.f32 %v2625_v49, %v1465_v46  ;;  %v1338_v55 = vmul.f32 %v3523_v44, %v1337_v53 }
 0x5de   : > { %v2629_v21 = vpop.eup %2628 }
 0x5df   : > { %v2631_v25 = vpop.eup %2630  ;;  %v1470_v26 = vsel %vm1469_vm6, %v2625_v49, %v1466_v18  ;;  %v1082_v27 = vmul.f32 %v2629_v21, %v1077_v5  ;;  %v3530_v13 = vpop.xlane.xlu0 %1079  ;;  %vm1087_vm9 = vweird.f32 %v2629_v21 }
 0x5e0   : > { %v3532_v28 = vpop.xlane.xlu2 %1711  ;;  %v1475_v29 = vsel %vm1472_vm7, %v1474_v22, %v1470_v26  ;;  %v1478_v30 = vmul.f32 %v2631_v25, %v3520_v6  ;;  %2634 = vrcp.f32 %v3530_v13  ;;  %v3539_v48 = vpop.eup %2632  ;;  %vm1088_vm12 = vmor %vm1086_vm10, %vm1087_vm9  ;;  %vm1483_vm13 = vweird.f32 %v2631_v25 }
 0x5e1   : > { %v1476_v43 = vmul.f32 %v3475_v31, %v1475_v29  ;;  %v1083_v34 = vsub.f32 1.0, %v1082_v27  ;;  %2636 = vrcp.f32 %v3532_v28  ;;  %v1346_v31 = vand.u32 2147483648, %v3461_v39  ;;  %vm1484_vm0 = vmor %vm1482_vm15, %vm1483_vm13 }
 0x5e2   : > { %v1479_v9 = vsub.f32 1.0, %v1478_v30  ;;  %v1351_v60 = vmul.f32 %v3539_v48, %v3525_v14  ;;  %v1107_v3 = vand.u32 2147483648, %v3530_v13  ;;  %v1105_v18 = vand.u32 2147483647, %v3530_v13  ;;  %vm3582_vm9 = vmor %vm1340_vm11, %vm1341_vm3 }
 0x5e3   : > { %v1084_v15 = vmul.f32 %v2629_v21, %v1083_v34  ;;  %v1495_v45 = vmul.f32 %v1493_v35, %v1476_v43  ;;  %vm1101_vm4 = vweird.f32 %v3530_v13  ;;  %vm1721_vm7 = vweird.f32 %v3532_v28 }
 0x5e4   : > { %v1480_v24 = vmul.f32 %v2631_v25, %v1479_v9  ;;  %v1727_v27 = vand.u32 2147483648, %v3532_v28  ;;  %v1108_v30 = vor.u32 1.1754944e-38, %v1107_v3  ;;  %v1725_v34 = vand.u32 2147483647, %v3532_v28  ;;  %v1747_v3 = vld [vmem:[#allocation8 + $0x70] sm:$0xff] }
 0x5e5   : > { %v1085_v47 = vadd.f32 %v2629_v21, %v1084_v15  ;;  %2368 = vmatmul.msk.f32.vlgmr.msrb.gmra.mxu2 %vm629_vm8, %v1495_v45  ;;  %vm1106_vm10 = vcmp.eq.f32.partialorder %v1105_v18, 8.507059e+37  ;;  %v1347_v53 = vor.u32 1.1754944e-38, %v1346_v31  ;;  %vm1345_vm11 = vcmp.eq.f32.partialorder %v1344_v17, 8.507059e+37 }
 0x5e6   : > { %v3543_v50 = vpop.eup %2634  ;;  %v1481_v52 = vadd.f32 %v2631_v25, %v1480_v24  ;;  %v1113_v24 = vld [vmem:[#allocation8 + $0x28] sm:$0xff]  ;;  %v1728_v45 = vor.u32 1.1754944e-38, %v1727_v27  ;;  %vm1726_vm13 = vcmp.eq.f32.partialorder %v1725_v34, 8.507059e+37  ;;  %vm1355_vm15 = vweird.f32 %v3525_v14 }
 0x5e7   : > { %v1089_v56 = vsel %vm1088_vm12, %v2629_v21, %v1085_v47  ;;  %v1097_v57 = vmul.f32 %v3543_v50, %v3530_v13  ;;  %v2637_v59 = vpop.eup %2636  ;;  %vm1102_vm2 = vweird.f32 %v3543_v50  ;;  %v1367_v34 = vld [vmem:[#allocation8 + $0x48] sm:$0xff] }
 0x5e8   : > { %v3551_v58 = vpop.xlane.xlu2 %1584  ;;  %v1094_v62 = vsel %vm1091_vm14, %v1093_v51, %v1089_v56  ;;  %v1717_v49 = vmul.f32 %v2637_v59, %v3532_v28  ;;  %v1485_v5 = vsel %vm1484_vm0, %v2631_v25, %v1481_v52  ;;  %vm1722_vm5 = vweird.f32 %v2637_v59  ;;  %vm3572_vm6 = vmor %vm1101_vm4, %vm1102_vm2 }
 0x5e9   : > { %v1095_v2 = vmul.f32 %v3483_v19, %v1094_v62  ;;  %v1098_v1 = vsub.f32 1.0, %v1097_v57  ;;  %2638 = vrcp.f32 %v3551_v58  ;;  %v1490_v46 = vsel %vm1487_vm1, %v1489_v63, %v1485_v5  ;;  %vm3593_vm12 = vmor %vm1721_vm7, %vm1722_vm5  ;;  %v1874_v5 = vld [vmem:[#allocation10 + $0x60] sm:$0xff] }
 0x5ea   : > { %v1718_v6 = vsub.f32 1.0, %v1717_v49  ;;  %v1339_v19 = vadd.f32 %v3523_v44, %v1338_v55  ;;  %v1491_v21 = vmul.f32 %v3481_v36, %v1490_v46  ;;  %v1352_v25 = vsub.f32 1.0, %v1351_v60 }
 0x5eb   : > { %v1099_v7 = vmul.f32 %v3543_v50, %v1098_v1  ;;  %v1114_v10 = vmul.f32 %v1112_v0, %v1095_v2  ;;  %v1361_v56 = vand.u32 2147483648, %v3525_v14  ;;  %vm1356_vm14 = vweird.f32 %v3539_v48 }
 0x5ec   : > { %v1719_v22 = vmul.f32 %v2637_v59, %v1718_v6  ;;  %v1496_v36 = vmul.f32 %v1494_v12, %v1491_v21  ;;  %v1343_v28 = vsel %vm3582_vm9, %v3523_v44, %v1339_v19  ;;  %v1353_v20 = vmul.f32 %v3539_v48, %v1352_v25  ;;  %v2545_v44 = vpop.permute.xlu1 %2544  ;;  %vm3623_vm0 = vmor %vm1355_vm15, %vm1356_vm14 }
 0x5ed   : > { %v1100_v41 = vadd.f32 %v3543_v50, %v1099_v7  ;;  %2350 = vmatmul.msk.f32.vlgmr.msra.gmra.mxu0 %vm629_vm8, %v1114_v10  ;;  %v1348_v52 = vsel %vm1345_vm11, %v1347_v53, %v1343_v28  ;;  %v2546_v62 = vunpack.i.l.bf16 %v2545_v44  ;;  %v1359_v2 = vand.u32 2147483647, %v3525_v14  ;;  %v1366_v7 = vld [vmem:[#allocation8 + $0x40] sm:$0xff] }
 0x5ee   : > { %v1720_v43 = vadd.f32 %v2637_v59, %v1719_v22  ;;  %2369 = vmatmul.msk.f32.gmra.mxu2 %vm629_vm8, %v1496_v36  ;;  %v1354_v60 = vadd.f32 %v3539_v48, %v1353_v20  ;;  %v1349_v39 = vmul.f32 %v3416_v37, %v1348_v52  ;;  %v2547_v1 = vunpack.i.h.bf16 %v2545_v44  ;;  %v1621_v52 = vld [vmem:[#allocation8 + $0x68] sm:$0xff] }
 0x5ef   : > { %v3578_v29 = vpop.eup %2638  ;;  %v1104_v4 = vsel %vm3572_vm6, %v3543_v50, %v1100_v41  ;;  %v1362_v37 = vor.u32 1.1754944e-38, %v1361_v56  ;;  %vm1360_vm2 = vcmp.eq.f32.partialorder %v1359_v2, 8.507059e+37  ;;  %v1600_v26 = vand.u32 2147483648, %v3551_v58 }
 0x5f0   : > { %v3587_v35 = vpop.xlane.xlu2 %1714  ;;  %v1724_v15 = vsel %vm3593_vm12, %v2637_v59, %v1720_v43  ;;  %v1109_v38 = vsel %vm1106_vm10, %v1108_v30, %v1104_v4  ;;  %v1590_v47 = vmul.f32 %v3578_v29, %v3551_v58  ;;  %v1358_v14 = vsel %vm3623_vm0, %v3539_v48, %v1354_v60  ;;  %v1748_v43 = vld [vmem:[#allocation8 + $0x78] sm:$0xff] }
 0x5f1   : > { %2640 = vrcp.f32 %v3587_v35  ;;  %v1110_v51 = vmul.f32 %v3490_v40, %v1109_v38  ;;  %v1729_v33 = vsel %vm1726_vm13, %v1728_v45, %v1724_v15  ;;  %v1742_v10 = vand.u32 2147483648, %v3587_v35 }
 0x5f2   : > { %v2535_v50 = vpop.permute.xlu0 %2534  ;;  %v1591_v40 = vsub.f32 1.0, %v1590_v47  ;;  %v1730_v17 = vmul.f32 %v3492_v42, %v1729_v33  ;;  %v1740_v19 = vand.u32 2147483647, %v3587_v35  ;;  %v1368_v21 = vmul.f32 %v1366_v7, %v1349_v39  ;;  %v1871_v7 = vld [vmem:[#allocation10 + $0x48] sm:$0xff] }
 0x5f3   : > { %v2536_v31 = vunpack.i.l.bf16 %v2535_v50  ;;  %v1115_v55 = vmul.f32 %v1113_v24, %v1110_v51  ;;  %v2537_v57 = vunpack.i.h.bf16 %v2535_v50  ;;  %vm1736_vm3 = vweird.f32 %v3587_v35 }
 0x5f4   : > { %v1592_v6 = vmul.f32 %v3578_v29, %v1591_v40  ;;  %v1749_v18 = vmul.f32 %v1747_v3, %v1730_v17  ;;  %v1363_v22 = vsel %vm1360_vm2, %v1362_v37, %v1358_v14  ;;  %vm1595_vm4 = vweird.f32 %v3578_v29  ;;  %v1875_v3 = vld [vmem:[#allocation10 + $0x68] sm:$0xff]  ;;  %v1873_v37 = vld [vmem:[#allocation10 + $0x58] sm:$0xff] }
 0x5f5   : > { %1396 = vmatpush.msrb.mxu0 %v2536_v31  ;;  %v1743_v48 = vor.u32 1.1754944e-38, %v1742_v10  ;;  %vm1741_vm6 = vcmp.eq.f32.partialorder %v1740_v19, 8.507059e+37  ;;  %vm1594_vm7 = vweird.f32 %v3551_v58  ;;  %v1598_v36 = vand.u32 2147483647, %v3551_v58  ;;  %v1869_v10 = vld [vmem:[#allocation10 + $0x38] sm:$0xff]  ;;  %v1867_v14 = vld [vmem:[#allocation10 + $0x28] sm:$0xff] }
 0x5f6   : > { %2351 = vmatmul.msk.f32.gmra.mxu0 %vm629_vm8, %v1115_v55  ;;  %v1593_v25 = vadd.f32 %v3578_v29, %v1592_v6  ;;  %v1364_v13 = vmul.f32 %v3450_v23, %v1363_v22  ;;  %vm1596_vm9 = vmor %vm1594_vm7, %vm1595_vm4  ;;  %v1601_v9 = vor.u32 1.1754944e-38, %v1600_v26  ;;  %v1620_v23 = vld [vmem:[#allocation8 + $0x60] sm:$0xff]  ;;  %v1865_v19 = vld [vmem:[#allocation10 + $0x18] sm:$0xff]  ;;  %vm1844_vm15 = vcmask 261120  }
 0x5f7   : > { %v2641_v59 = vpop.eup %2640  ;;  %1397 = vmatpush.msrb.mxu0 %v2537_v57  ;;  %vm1599_vm10 = vcmp.eq.f32.partialorder %v1598_v36, 8.507059e+37  ;;  %v1870_v6 = vld [vmem:[#allocation10 + $0x40] sm:$0xff]  ;;  %vm1847_vm0 = vcmask 392192   ;;  %vm1853_vm2 = vcmask 654336   ;;  %vm1859_vm4 = vcmask 916480  }
 0x5f8   : > { %v1732_v63 = vmul.f32 %v2641_v59, %v3587_v35  ;;  %v2540_v0 = vpop.permute.xlu2 %2539  ;;  %vm1737_vm1 = vweird.f32 %v2641_v59  ;;  %v1597_v4 = vsel %vm1596_vm9, %v3578_v29, %v1593_v25  ;;  %v1369_v53 = vmul.f32 %v1367_v34, %v1364_v13 }
 0x5f9   : > { %v2541_v49 = vunpack.i.l.bf16 %v2540_v0  ;;  %1650 = vmatpush.msra.mxu0 %v2546_v62  ;;  %v2542_v46 = vunpack.i.h.bf16 %v2540_v0  ;;  %vm1738_vm5 = vmor %vm1736_vm3, %vm1737_vm1  ;;  %v1602_v15 = vsel %vm1599_vm10, %v1601_v9, %v1597_v4  ;;  %vm1850_vm1 = vcmask 523264  }
 0x5fa   : > { %v1733_v42 = vsub.f32 1.0, %v1732_v63  ;;  %v1603_v58 = vmul.f32 %v3500_v54, %v1602_v15  ;;  %vm1856_vm3 = vcmask 785408  }
 0x5fb   : > { %1651 = vmatpush.msra.mxu0 %v2547_v1  ;;  %1777 = vmatpush.msra.mxu2 %v2541_v49  ;;  %v1877_v1 = vld [vmem:[#allocation10 + $0x78] sm:$0xff]  ;;  %v1876_v49 = vld [vmem:[#allocation10 + $0x70] sm:$0xff] }
 0x5fc   : > { %v1734_v12 = vmul.f32 %v2641_v59, %v1733_v42  ;;  %v1622_v38 = vmul.f32 %v1620_v23, %v1603_v58  ;;  %1882 = vmatpush.msrb.mxu3 %v1877_v1  ;;  %v1872_v42 = vld [vmem:[#allocation10 + $0x50] sm:$0xff]  ;;  %v1987_v1 = vld [vmem:[#allocation11 + $0xe0] sm:$0xff] }
 0x5fd   : > { %1778 = vmatpush.msra.mxu2 %v2542_v46  ;;  %v1868_v46 = vld [vmem:[#allocation10 + $0x30] sm:$0xff] }
 0x5fe   : > { %v1735_v41 = vadd.f32 %v2641_v59, %v1734_v12  ;;  %2380 = vmatmul.msk.f32.vlgmr.msra.gmra.mxu2 %vm629_vm8, %v1749_v18  ;;  %2362 = vmatmul.msk.f32.vlgmr.msrb.gmra.mxu0 %vm629_vm8, %v1368_v21  ;;  %v1866_v12 = vld [vmem:[#allocation10 + $0x20] sm:$0xff]  ;;  %v1864_v18 = vld [vmem:[#allocation10 + $0x10] sm:$0xff]  ;;  %v1863_v21 = vld [vmem:[#allocation10 + $0x8] sm:$0xff] }
 0x5ff   : > { %1883 = vmatpush.msrb.mxu3 %v1876_v49  ;;  %v1988_v49 = vld [vmem:[#allocation11 + $0xe8] sm:$0xff] }
 0x600   : > { %v1739_v27 = vsel %vm1738_vm5, %v2641_v59, %v1735_v41  ;;  %v1862_v41 = vld [vmem:[#allocation10] sm:$0xff]  ;;  %v2550_v22 = vpop.permute.xlu2 %2549 }
 0x601   : > { %v1744_v30 = vsel %vm1741_vm6, %v1743_v48, %v1739_v27  ;;  %1884 = vmatpush.msrb.mxu3 %v1875_v3  ;;  %v2551_v26 = vunpack.i.l.bf16 %v2550_v22  ;;  %v2552_v23 = vunpack.i.h.bf16 %v2550_v22  ;;  %v1975_v22 = vld [vmem:[#allocation11 + $0x80] sm:$0xff] }
 0x602   : > { %v1745_v35 = vmul.f32 %v3504_v32, %v1744_v30 }
 0x603   : > { %1885 = vmatpush.msrb.mxu3 %v1874_v5  ;;  %v1842_v13 = vsel %vm629_vm8, %v3383_v11, %v2551_v26  ;;  %v1974_v26 = vld [vmem:[#allocation11 + $0x78] sm:$0xff] }
 0x604   : > { %v1750_v28 = vmul.f32 %v1748_v43, %v1745_v35 }
 0x605   : > { %1886 = vmatpush.msrb.mxu3 %v1873_v37 }
 0x606   : > { %2381 = vmatmul.msk.f32.gmra.mxu2 %vm629_vm8, %v1750_v28  ;;  %2363 = vmatmul.msk.f32.gmra.mxu0 %vm629_vm8, %v1369_v53 }
 0x607   : > { %1887 = vmatpush.msrb.mxu3 %v1872_v42 }
 0x609   : > { %1888 = vmatpush.msrb.mxu3 %v1871_v7  ;;  %v1985_v7 = vld [vmem:[#allocation11 + $0xd0] sm:$0xff] }
 0x60b   : > { %1889 = vmatpush.msrb.mxu3 %v1870_v6  ;;  %v1986_v6 = vld [vmem:[#allocation11 + $0xd8] sm:$0xff] }
 0x60d   : > { %1890 = vmatpush.msrb.mxu3 %v1869_v10  ;;  %v1983_v10 = vld [vmem:[#allocation11 + $0xc0] sm:$0xff] }
 0x60e   : > { %2374 = vmatmul.msk.f32.vlgmr.msra.gmra.mxu0 %vm629_vm8, %v1622_v38 }
 0x60f   : > { %1891 = vmatpush.msrb.mxu3 %v1868_v46  ;;  %v1984_v46 = vld [vmem:[#allocation11 + $0xc8] sm:$0xff] }
 0x611   : > { %1892 = vmatpush.msrb.mxu3 %v1867_v14  ;;  %v1981_v14 = vld [vmem:[#allocation11 + $0xb0] sm:$0xff] }
 0x613   : > { %1893 = vmatpush.msrb.mxu3 %v1866_v12  ;;  %v1982_v12 = vld [vmem:[#allocation11 + $0xb8] sm:$0xff] }
 0x615   : > { %1894 = vmatpush.msrb.mxu3 %v1865_v19  ;;  %v1979_v19 = vld [vmem:[#allocation11 + $0xa0] sm:$0xff] }
 0x617   : > { %1895 = vmatpush.msrb.mxu3 %v1864_v18  ;;  %v1980_v18 = vld [vmem:[#allocation11 + $0xa8] sm:$0xff] }
 0x619   : > { %1896 = vmatpush.msrb.mxu3 %v1863_v21  ;;  %v1977_v21 = vld [vmem:[#allocation11 + $0x90] sm:$0xff] }
 0x61b   : > { %1897 = vmatpush.msrb.mxu3 %v1862_v41  ;;  %v1978_v41 = vld [vmem:[#allocation11 + $0x98] sm:$0xff] }
 0x61d   : > { %v1588_v24 = vpop.xlane.xlu0 %1587 }
 0x61e   : > { %2642 = vrcp.f32 %v1588_v24  ;;  %v1615_v45 = vand.u32 2147483648, %v1588_v24  ;;  %v1613_v50 = vand.u32 2147483647, %v1588_v24  ;;  %vm1609_vm11 = vweird.f32 %v1588_v24 }
 0x620   : > { %v1616_v44 = vor.u32 1.1754944e-38, %v1615_v45  ;;  %vm1614_vm14 = vcmp.eq.f32.partialorder %v1613_v50, 8.507059e+37 }
 0x624   : > { %v2643_v32 = vpop.eup %2642 }
 0x625   : > { %v1605_v20 = vmul.f32 %v2643_v32, %v1588_v24  ;;  %vm1610_vm12 = vweird.f32 %v2643_v32  ;;  %v1843_v24 = vsel %vm629_vm8, %v3389_v16, %v2552_v23  ;;  %v2570_v16 = vld [vmem:[%s3756_s6] ss:$0 sm:$0xff] }
 0x626   : > { %vm1611_vm13 = vmor %vm1609_vm11, %vm1610_vm12 }
 0x627   : > { %v1606_v29 = vsub.f32 1.0, %v1605_v20 }
 0x629   : > { %v1607_v47 = vmul.f32 %v2643_v32, %v1606_v29 }
 0x62b   : > { %v1608_v51 = vadd.f32 %v2643_v32, %v1607_v47 }
 0x62d   : > { %v1612_v31 = vsel %vm1611_vm13, %v2643_v32, %v1608_v51 }
 0x62e   : > { %v1617_v54 = vsel %vm1614_vm14, %v1616_v44, %v1612_v31 }
 0x62f   : > { %v1618_v33 = vmul.f32 %v3514_v61, %v1617_v54 }
 0x631   : > { %v1623_v55 = vmul.f32 %v1621_v52, %v1618_v33 }
 0x633   : > { %2375 = vmatmul.msk.f32.gmra.mxu0 %vm629_vm8, %v1623_v55 }
 0x639   : > { %v2555_v36 = vpop.permute.xlu0 %2554 }
 0x63a   : > { %v2556_v35 = vunpack.i.l.bf16 %v2555_v36  ;;  %v2557_v29 = vunpack.i.h.bf16 %v2555_v36  ;;  %v1972_v36 = vld [vmem:[#allocation11 + $0x68] sm:$0xff] }
 0x668   : > { %v1526_v56 = vpop.f32.mrf.mxu2 }
 0x669   : > { %1820 = vrot.lane.b32.xlu2 %v1526_v56, %s2964_s4  ;;  %v2656_v56 = vld [vmem:[%s3187_s21] sm:$0xff] }
 0x66a   : > { %v1145_v57 = vpop.f32.mrf.mxu0 }
 0x671   : > { %v1529_v62 = vpop.f32.mrf.mxu2 }
 0x673   : > { %v1148_v59 = vpop.f32.mrf.mxu0 }
 0x674   : > { %v2558_v60 = vpack.i.bf16 %v1148_v59, %v1145_v57 }
 0x676   : > { %2559 = vrot.lane.b32.xlu2 %v2558_v60, %s2967_s14  ;;  %s2388_s14 = sshll.u32 %s3065_s15, 4 }
 0x677   : > { %s2177_s1 = scalar_lea.hbm %s3799_s12, %s2388_s14 }
 0x67b   : > { %v1399_v40 = vpop.f32.mrf.mxu0 }
 0x681   : > { %v1780_v39 = vpop.f32.mrf.mxu2 }
 0x682   : > { %1836 = vrot.lane.b32.xlu2 %v1780_v39, %s2962_s16 }
 0x683   : > { %v1402_v17 = vpop.f32.mrf.mxu0 }
 0x684   : > { %v2563_v63 = vpack.i.bf16 %v1402_v17, %v1399_v40 }
 0x686   : > { %2564 = vrot.lane.b32.xlu1 %v2563_v63, %s2966_s29  ;;  %s557_s29 = scalar_lea.vmem [#allocation14], %s2324_s9 }
 0x687   : > { %s2178_s11 = sshll.u32 %s557_s29, 4  ;;  %s2179_s11 = int_to_ptr.vmem [resolvable:$true] %s2178_s11 }
 0x689   : > { %v1783_v61 = vpop.f32.mrf.mxu2 }
 0x68a   : > { %1838 = vrot.lane.b32.xlu2 %v1783_v61, %s2962_s16 }
 0x68b   : > { %v1653_v0 = vpop.f32.mrf.mxu0 }
 0x68e   : > { %1828 = vrot.lane.b32.xlu1 %v1653_v0, %s2963_s30  ;;  %v1989_v0 = vld [vmem:[#allocation11 + $0xf0] sm:$0xff] }
 0x68f   : > { %1997 = vmatpush.msrb.mxu0 %v1989_v0 }
 0x691   : > { %1998 = vmatpush.msrb.mxu0 %v1987_v1 }
 0x693   : > { %1999 = vmatpush.msrb.mxu0 %v1985_v7 }
 0x695   : > { %2000 = vmatpush.msrb.mxu0 %v1983_v10 }
 0x696   : > { %1822 = vrot.lane.b32.xlu1 %v1529_v62, %s2964_s4  ;;  %v2657_v62 = vld [vmem:[%s3187_s21 + $0x8] sm:$0xff]  ;;  %s2180_s21 = sshll.u32 %s2177_s1, 4  ;;  %s2181_s21 = int_to_ptr.hbm [resolvable:$true] %s2180_s21 }
 0x697   : > { %2001 = vmatpush.msrb.mxu0 %v1981_v14  ;;  %v2106_v14 = vld [vmem:[#allocation13 + $0xd8] sm:$0xff]  ;;  %s2882_s9 = sshra.s32 %s2181_s21, 4  ;;  %s2883_s9 = int_to_ptr.hbm [resolvable:$true] %s2882_s9 }
 0x698   : > { %s2884_s15 = scalar_lea.hbm %s2883_s9, 16  ;;  %p2889_p12 = scmp.lt.s32.totalorder %s2883_s9, %s3799_s12 }
 0x699   : > { %2002 = vmatpush.msrb.mxu0 %v1979_v19  ;;  %v2105_v19 = vld [vmem:[#allocation13 + $0xd0] sm:$0xff]  ;;  %p2885_p1 = scmp.ne.s32.totalorder %s2883_s9, %s2884_s15 }
 0x69b   : > { %2003 = vmatpush.msrb.mxu0 %v1977_v21  ;;  %v2104_v21 = vld [vmem:[#allocation13 + $0xc8] sm:$0xff]  ;;  %p2886_p3 = pnand %p2885_p1, %p3147_p5 }
 0x69d   : > { %2004 = vmatpush.msrb.mxu0 %v1975_v22  ;;  %v2103_v22 = vld [vmem:[#allocation13 + $0xc0] sm:$0xff]  ;;  %p2887_p4 = pneg %p2886_p3 }
 0x6b0   : > { %v1656_v2 = vpop.f32.mrf.mxu0 }
 0x6b1   : > { %1830 = vrot.lane.b32.xlu0 %v1656_v2, %s2963_s30  ;;  %v1990_v2 = vld [vmem:[#allocation11 + $0xf8] sm:$0xff]  ;;  %s2888_s30 = scalar_lea.hbm %s3799_s12, 32 }
 0x6b2   : > { %2020 = vmatpush.msrb.mxu1 %v1990_v2  ;;  %p2890_p7 = scmp.lt.s32.totalorder %s2888_s30, %s2884_s15 }
 0x6b4   : > { %2021 = vmatpush.msrb.mxu1 %v1988_v49  ;;  %p2891_p8 = por %p2890_p7, %p2889_p12 }
 0x6b6   : > { %2022 = vmatpush.msrb.mxu1 %v1986_v6  ;;  %p2892_p9 = pnand %p2891_p8, %p2887_p4 }
 0x6b8   : > { %2023 = vmatpush.msrb.mxu1 %v1984_v46  ;;  %v2090_v46 = vld [vmem:[#allocation13 + $0x58] sm:$0xff] }
 0x6ba   : > { %2024 = vmatpush.msrb.mxu1 %v1982_v12  ;;  %v2089_v12 = vld [vmem:[#allocation13 + $0x50] sm:$0xff] }
 0x6bc   : > { %2025 = vmatpush.msrb.mxu1 %v1980_v18  ;;  %v2088_v18 = vld [vmem:[#allocation13 + $0x48] sm:$0xff] }
 0x6be   : > { %2026 = vmatpush.msrb.mxu1 %v1978_v41  ;;  %v2087_v41 = vld [vmem:[#allocation13 + $0x40] sm:$0xff] }
 0x6c3   : > { %v1821_v25 = vpop.permute.xlu2 %1820 }
 0x6d0   : > { %v2560_v48 = vpop.permute.xlu2 %2559 }
 0x6d1   : > { %v2561_v27 = vunpack.i.l.bf16 %v2560_v48  ;;  %v2562_v38 = vunpack.i.h.bf16 %v2560_v48  ;;  %v1973_v48 = vld [vmem:[#allocation11 + $0x70] sm:$0xff] }
 0x6d2   : > { %2005 = vmatpush.msrb.mxu0 %v1973_v48  ;;  %v2085_v48 = vld [vmem:[#allocation13 + $0x30] sm:$0xff] }
 0x6d3   : > { %v1845_v43 = vsel %vm1844_vm15, %v1842_v13, %v2561_v27  ;;  %v1846_v32 = vsel %vm1844_vm15, %v1843_v24, %v2562_v38  ;;  %v1971_v27 = vld [vmem:[#allocation11 + $0x60] sm:$0xff]  ;;  %v1969_v13 = vld [vmem:[#allocation11 + $0x50] sm:$0xff] }
 0x6d4   : > { %v1848_v4 = vsel %vm1847_vm0, %v1845_v43, %v2556_v35  ;;  %v1849_v47 = vsel %vm1847_vm0, %v1846_v32, %v2557_v29  ;;  %2006 = vmatpush.msrb.mxu0 %v1971_v27  ;;  %v1967_v43 = vld [vmem:[#allocation11 + $0x40] sm:$0xff]  ;;  %v1965_v35 = vld [vmem:[#allocation11 + $0x30] sm:$0xff]  ;;  %v2084_v27 = vld [vmem:[#allocation13 + $0x28] sm:$0xff] }
 0x6d6   : > { %2007 = vmatpush.msrb.mxu0 %v1969_v13  ;;  %v2083_v13 = vld [vmem:[#allocation13 + $0x20] sm:$0xff] }
 0x6d8   : > { %2008 = vmatpush.msrb.mxu0 %v1967_v43  ;;  %v2082_v43 = vld [vmem:[#allocation13 + $0x18] sm:$0xff] }
 0x6da   : > { %2009 = vmatpush.msrb.mxu0 %v1965_v35  ;;  %v2081_v35 = vld [vmem:[#allocation13 + $0x10] sm:$0xff] }
 0x6dc   : > { %v1837_v15 = vpop.permute.xlu2 %1836 }
 0x6e4   : > { %v1839_v31 = vpop.permute.xlu2 %1838 }
 0x6f8   : > { %v2565_v30 = vpop.permute.xlu1 %2564 }
 0x6f9   : > { %v2566_v34 = vunpack.i.l.bf16 %v2565_v30  ;;  %v2567_v20 = vunpack.i.h.bf16 %v2565_v30  ;;  %v1970_v30 = vld [vmem:[#allocation11 + $0x58] sm:$0xff] }
 0x6fb   : > { %v1851_v9 = vsel %vm1850_vm1, %v1848_v4, %v2566_v34  ;;  %v1852_v50 = vsel %vm1850_vm1, %v1849_v47, %v2567_v20  ;;  %v1968_v34 = vld [vmem:[#allocation11 + $0x48] sm:$0xff]  ;;  %v1966_v4 = vld [vmem:[#allocation11 + $0x38] sm:$0xff] }
 0x6fc   : > { %v1854_v53 = vsel %vm1853_vm2, %v1851_v9, %v1821_v25  ;;  %v1976_v25 = vld [vmem:[#allocation11 + $0x88] sm:$0xff]  ;;  %v1963_v9 = vld [vmem:[#allocation11 + $0x20] sm:$0xff] }
 0x6fd   : > { %2027 = vmatpush.msrb.mxu1 %v1976_v25  ;;  %2010 = vmatpush.msrb.mxu0 %v1963_v9  ;;  %v2086_v25 = vld [vmem:[#allocation13 + $0x38] sm:$0xff]  ;;  %v2080_v9 = vld [vmem:[#allocation13 + $0x8] sm:$0xff] }
 0x6ff   : > { %2028 = vmatpush.msrb.mxu1 %v1974_v26  ;;  %v2101_v26 = vld [vmem:[#allocation13 + $0xb0] sm:$0xff] }
 0x700   : > { %v1829_v28 = vpop.permute.xlu1 %1828 }
 0x701   : > { %v1857_v11 = vsel %vm1856_vm3, %v1854_v53, %v1829_v28  ;;  %2029 = vmatpush.msrb.mxu1 %v1972_v36  ;;  %v1964_v28 = vld [vmem:[#allocation11 + $0x28] sm:$0xff]  ;;  %v1961_v53 = vld [vmem:[#allocation11 + $0x10] sm:$0xff] }
 0x702   : > { %v1860_v58 = vsel %vm1859_vm4, %v1857_v11, %v1837_v15  ;;  %v1962_v15 = vld [vmem:[#allocation11 + $0x18] sm:$0xff]  ;;  %v1959_v11 = vld [vmem:[#allocation11] sm:$0xff]  ;;  %2011 = vmatpush.msrb.mxu0 %v1961_v53  ;;  %v2100_v36 = vld [vmem:[#allocation13 + $0xa8] sm:$0xff] }
 0x703   : > { %1898 = vmatmul.f32.vlgmr.msrb.gmra.mxu3 %v1860_v58  ;;  %2030 = vmatpush.msrb.mxu1 %v1970_v30  ;;  %v1960_v58 = vld [vmem:[#allocation11 + $0x8] sm:$0xff]  ;;  %v2099_v30 = vld [vmem:[#allocation13 + $0xa0] sm:$0xff] }
 0x704   : > { %2012 = vmatpush.msrb.mxu0 %v1959_v11  ;;  %v2079_v53 = vld [vmem:[#allocation13] sm:$0xff]  ;;  %v1991_v11 = vld [vmem:[%s3760_s10] sm:$0x3] }
 0x705   : > { %2031 = vmatpush.msrb.mxu1 %v1968_v34  ;;  %v2098_v34 = vld [vmem:[#allocation13 + $0x98] sm:$0xff] }
 0x707   : > { %2032 = vmatpush.msrb.mxu1 %v1966_v4  ;;  %v2097_v4 = vld [vmem:[#allocation13 + $0x90] sm:$0xff] }
 0x708   : > { %v1823_v45 = vpop.permute.xlu1 %1822 }
 0x709   : > { %v1855_v51 = vsel %vm1853_vm2, %v1852_v50, %v1823_v45  ;;  %2033 = vmatpush.msrb.mxu1 %v1964_v28  ;;  %v2096_v28 = vld [vmem:[#allocation13 + $0x88] sm:$0xff] }
 0x70b   : > { %2034 = vmatpush.msrb.mxu1 %v1962_v15  ;;  %v2095_v15 = vld [vmem:[#allocation13 + $0x80] sm:$0xff] }
 0x70d   : > { %2035 = vmatpush.msrb.mxu1 %v1960_v58  ;;  %v1993_v58 = vperm.slane %v1991_v11, 0 }
 0x723   : > { %v1831_v44 = vpop.permute.xlu0 %1830 }
 0x724   : > { %v1858_v54 = vsel %vm1856_vm3, %v1855_v51, %v1831_v44  ;;  %v2571_v51 = vld [vmem:[%s3757_s7] ss:$0 sm:$0xff] }
 0x725   : > { %v1861_v52 = vsel %vm1859_vm4, %v1858_v54, %v1839_v31  ;;  %v2572_v54 = vld [vmem:[%s3758_s8] ss:$0 sm:$0xff] }
 0x726   : > { %1901 = vmatmul.f32.gmra.mxu3 %v1861_v52 }
 0x786   : > { %v1899_v33 = vpop.f32.mrf.mxu3 }
 0x787   : > { %v1900_v55 = vadd.f32 %v2570_v16, %v1899_v33  ;;  %v2094_v33 = vld [vmem:[#allocation13 + $0x78] sm:$0xff] }
 0x788   : > { %2115 = vmatpush.msrb.mxu2 %v2094_v33 }
 0x789   : > { %v3678_v57 = vadd.f32 %v2656_v56, %v1900_v55  ;;  %v2110_v55 = vld [vmem:[#allocation13 + $0xf8] sm:$0xff]  ;;  %v2093_v56 = vld [vmem:[#allocation13 + $0x70] sm:$0xff] }
 0x78a   : > { %2138 = vmatpush.msra.mxu3 %v2110_v55  ;;  %2116 = vmatpush.msrb.mxu2 %v2093_v56 }
 0x78b   : > { %1909 = vadd.xlane.f32.xlu1 %v3678_v57 }
 0x7a9   : > { %v1902_v59 = vpop.f32.mrf.mxu3 }
 0x7aa   : > { %v1903_v60 = vadd.f32 %v2570_v16, %v1902_v59  ;;  %v2109_v59 = vld [vmem:[#allocation13 + $0xf0] sm:$0xff] }
 0x7ab   : > { %2139 = vmatpush.msra.mxu3 %v2109_v59 }
 0x7ac   : > { %v3682_v40 = vadd.f32 %v2657_v62, %v1903_v60  ;;  %v2092_v60 = vld [vmem:[#allocation13 + $0x68] sm:$0xff] }
 0x7ad   : > { %v2108_v62 = vld [vmem:[#allocation13 + $0xe8] sm:$0xff]  ;;  %2117 = vmatpush.msrb.mxu2 %v2092_v60 }
 0x7ae   : > { %1911 = vadd.xlane.f32.xlu0 %v3682_v40  ;;  %2140 = vmatpush.msra.mxu3 %v2108_v62 }
 0x7fe   : > { %v1910_v39 = vpop.xlane.xlu1 %1909 }
 0x7ff   : > { %v1913_v17 = vmul.f32 %v1910_v39, %v3207_v8 }
 0x801   : > { %v3687_v63 = vsub.f32 %v3678_v57, %v1913_v17 }
 0x803   : > { %v1917_v61 = vmul.f32 %v3687_v63, %v3687_v63 }
 0x805   : > { %1919 = vadd.xlane.f32.xlu2 %v1917_v61  ;;  %v2107_v61 = vld [vmem:[#allocation13 + $0xe0] sm:$0xff] }
 0x806   : > { %2141 = vmatpush.msra.mxu3 %v2107_v61 }
 0x808   : > { %2142 = vmatpush.msra.mxu3 %v2106_v14 }
 0x80a   : > { %2143 = vmatpush.msra.mxu3 %v2105_v19 }
 0x80c   : > { %2144 = vmatpush.msra.mxu3 %v2104_v21 }
 0x80e   : > { %2145 = vmatpush.msra.mxu3 %v2103_v22 }
 0x821   : > { %v1912_v3 = vpop.xlane.xlu0 %1911 }
 0x822   : > { %v1914_v5 = vmul.f32 %v1912_v3, %v3207_v8 }
 0x824   : > { %v3693_v37 = vsub.f32 %v3682_v40, %v1914_v5 }
 0x826   : > { %v1918_v42 = vmul.f32 %v3693_v37, %v3693_v37 }
 0x828   : > { %1921 = vadd.xlane.f32.xlu1 %v1918_v42 }
 0x878   : > { %v1920_v23 = vpop.xlane.xlu2 %1919 }
 0x879   : > { %v1923_v38 = vmul.f32 %v1920_v23, %v3207_v8  ;;  %v1994_v23 = vperm.slane %v1991_v11, 1 }
 0x87b   : > { %v1925_v24 = vadd.f32 1e-05, %v1923_v38 }
 0x87d   : > { %2644 = vrsqrt.f32 %v1925_v24  ;;  %vm1933_vm5 = vweird.f32 %v1925_v24 }
 0x883   : > { %v2645_v32 = vpop.eup %2644 }
 0x884   : > { %v1928_v20 = vmul.f32 %v2645_v32, %v1925_v24  ;;  %vm1934_vm8 = vweird.f32 %v2645_v32 }
 0x885   : > { %vm1935_vm6 = vmor %vm1933_vm5, %vm1934_vm8 }
 0x886   : > { %v1929_v29 = vmul.f32 %v2645_v32, %v1928_v20 }
 0x888   : > { %v1930_v45 = vmul.f32 0.5, %v1929_v29 }
 0x88a   : > { %v1931_v47 = vsub.f32 1.5, %v1930_v45 }
 0x88c   : > { %v1932_v50 = vmul.f32 %v2645_v32, %v1931_v47 }
 0x88e   : > { %v1936_v44 = vsel %vm1935_vm6, %v2645_v32, %v1932_v50 }
 0x88f   : > { %v1947_v31 = vmul.f32 %v1936_v44, %v3687_v63  ;;  %v2091_v63 = vld [vmem:[#allocation13 + $0x60] sm:$0xff] }
 0x890   : > { %2118 = vmatpush.msrb.mxu2 %v2091_v63 }
 0x891   : > { %v1952_v52 = vmul.f32 %v2571_v51, %v1947_v31 }
 0x892   : > { %2119 = vmatpush.msrb.mxu2 %v2090_v46 }
 0x893   : > { %v1957_v16 = vadd.f32 %v2572_v54, %v1952_v52 }
 0x894   : > { %2120 = vmatpush.msrb.mxu2 %v2089_v12 }
 0x895   : > { %2013 = vmatmul.f32.vlgmr.msrb.gmra.mxu0 %v1957_v16  ;;  %2036 = vmatmul.f32.vlgmr.msrb.gmra.mxu1 %v1957_v16 }
 0x896   : > { %2121 = vmatpush.msrb.mxu2 %v2088_v18 }
 0x898   : > { %2122 = vmatpush.msrb.mxu2 %v2087_v41 }
 0x89a   : > { %2123 = vmatpush.msrb.mxu2 %v2086_v25 }
 0x89b   : > { %v1922_v39 = vpop.xlane.xlu1 %1921 }
 0x89c   : > { %v1924_v17 = vmul.f32 %v1922_v39, %v3207_v8  ;;  %2124 = vmatpush.msrb.mxu2 %v2085_v48 }
 0x89e   : > { %v1926_v0 = vadd.f32 1e-05, %v1924_v17  ;;  %2125 = vmatpush.msrb.mxu2 %v2084_v27 }
 0x8a0   : > { %2646 = vrsqrt.f32 %v1926_v0  ;;  %vm1943_vm9 = vweird.f32 %v1926_v0  ;;  %2126 = vmatpush.msrb.mxu2 %v2083_v13 }
 0x8a2   : > { %2127 = vmatpush.msrb.mxu2 %v2082_v43 }
 0x8a4   : > { %2128 = vmatpush.msrb.mxu2 %v2081_v35 }
 0x8a6   : > { %v2647_v2 = vpop.eup %2646  ;;  %2129 = vmatpush.msrb.mxu2 %v2080_v9 }
 0x8a7   : > { %v1938_v1 = vmul.f32 %v2647_v2, %v1926_v0  ;;  %vm1944_vm7 = vweird.f32 %v2647_v2 }
 0x8a8   : > { %vm1945_vm10 = vmor %vm1943_vm9, %vm1944_vm7  ;;  %2130 = vmatpush.msrb.mxu2 %v2079_v53 }
 0x8a9   : > { %v1939_v49 = vmul.f32 %v2647_v2, %v1938_v1 }
 0x8ab   : > { %v1940_v3 = vmul.f32 0.5, %v1939_v49 }
 0x8ad   : > { %v1941_v5 = vsub.f32 1.5, %v1940_v3 }
 0x8af   : > { %v1942_v42 = vmul.f32 %v2647_v2, %v1941_v5 }
 0x8b1   : > { %v1946_v7 = vsel %vm1945_vm10, %v2647_v2, %v1942_v42 }
 0x8b2   : > { %v1948_v8 = vmul.f32 %v1946_v7, %v3693_v37  ;;  %v2102_v37 = vld [vmem:[#allocation13 + $0xb8] sm:$0xff] }
 0x8b3   : > { %2146 = vmatpush.msra.mxu3 %v2102_v37  ;;  %v2573_v37 = vld [vmem:[%s3798_s17] ss:$0 sm:$0xff] }
 0x8b4   : > { %v1953_v6 = vmul.f32 %v2571_v51, %v1948_v8 }
 0x8b5   : > { %2147 = vmatpush.msra.mxu3 %v2101_v26 }
 0x8b6   : > { %v1958_v10 = vadd.f32 %v2572_v54, %v1953_v6 }
 0x8b7   : > { %2148 = vmatpush.msra.mxu3 %v2100_v36 }
 0x8b8   : > { %2016 = vmatmul.f32.gmra.mxu0 %v1958_v10  ;;  %2039 = vmatmul.f32.gmra.mxu1 %v1958_v10 }
 0x8b9   : > { %2149 = vmatpush.msra.mxu3 %v2099_v30 }
 0x8bb   : > { %2150 = vmatpush.msra.mxu3 %v2098_v34 }
 0x8bd   : > { %2151 = vmatpush.msra.mxu3 %v2097_v4 }
 0x8bf   : > { %2152 = vmatpush.msra.mxu3 %v2096_v28 }
 0x8c1   : > { %2153 = vmatpush.msra.mxu3 %v2095_v15 }
 0x912   : > { %v2014_v38 = vpop.f32.mrf.mxu0  ;;  %v2037_v24 = vpop.f32.mrf.mxu1 }
 0x913   : > { %v2015_v32 = vadd.f32 %v2014_v38, %v1993_v58  ;;  %v2038_v20 = vadd.f32 %v2037_v24, %v1994_v23 }
 0x915   : > { %v2047_v29 = vmul.f32 0.044715, %v2015_v32  ;;  %v2048_v45 = vmul.f32 0.044715, %v2038_v20  ;;  %v2043_v56 = vmul.f32 0.5, %v2015_v32  ;;  %v2044_v60 = vmul.f32 0.5, %v2038_v20 }
 0x917   : > { %v2051_v47 = vmul.f32 %v2047_v29, %v2015_v32  ;;  %v2052_v50 = vmul.f32 %v2048_v45, %v2038_v20 }
 0x919   : > { %v2055_v51 = vmul.f32 %v2051_v47, %v2015_v32  ;;  %v2056_v44 = vmul.f32 %v2052_v50, %v2038_v20 }
 0x91b   : > { %v2059_v31 = vadd.f32 %v2055_v51, %v2015_v32  ;;  %v2060_v54 = vadd.f32 %v2056_v44, %v2038_v20 }
 0x91d   : > { %v2063_v52 = vmul.f32 0.7978846, %v2059_v31  ;;  %v2064_v16 = vmul.f32 0.7978846, %v2060_v54 }
 0x91f   : > { %2648 = vtanh.f32 %v2063_v52 }
 0x920   : > { %2650 = vtanh.f32 %v2064_v16 }
 0x925   : > { %v2649_v33 = vpop.eup %2648 }
 0x926   : > { %v2651_v55 = vpop.eup %2650  ;;  %v2071_v59 = vadd.f32 1.0, %v2649_v33 }
 0x927   : > { %v2072_v62 = vadd.f32 1.0, %v2651_v55 }
 0x928   : > { %v2075_v39 = vmul.f32 %v2071_v59, %v2043_v56 }
 0x929   : > { %v2076_v17 = vmul.f32 %v2072_v62, %v2044_v60 }
 0x92a   : > { %2131 = vmatmul.f32.vlgmr.msrb.gmra.mxu2 %v2075_v39 }
 0x92b   : > { %2154 = vmatmul.f32.vlgmr.msra.gmra.mxu3 %v2076_v17 }
 0x935   : > { %v2017_v63 = vpop.f32.mrf.mxu0  ;;  %v2040_v61 = vpop.f32.mrf.mxu1 }
 0x936   : > { %v2018_v0 = vadd.f32 %v2017_v63, %v1993_v58  ;;  %v2041_v2 = vadd.f32 %v2040_v61, %v1994_v23 }
 0x938   : > { %v2049_v1 = vmul.f32 0.044715, %v2018_v0  ;;  %v2050_v49 = vmul.f32 0.044715, %v2041_v2  ;;  %v2045_v19 = vmul.f32 0.5, %v2018_v0  ;;  %v2046_v21 = vmul.f32 0.5, %v2041_v2 }
 0x93a   : > { %v2053_v3 = vmul.f32 %v2049_v1, %v2018_v0  ;;  %v2054_v5 = vmul.f32 %v2050_v49, %v2041_v2 }
 0x93c   : > { %v2057_v42 = vmul.f32 %v2053_v3, %v2018_v0  ;;  %v2058_v7 = vmul.f32 %v2054_v5, %v2041_v2 }
 0x93e   : > { %v2061_v8 = vadd.f32 %v2057_v42, %v2018_v0  ;;  %v2062_v6 = vadd.f32 %v2058_v7, %v2041_v2 }
 0x940   : > { %v2065_v10 = vmul.f32 0.7978846, %v2061_v8  ;;  %v2066_v46 = vmul.f32 0.7978846, %v2062_v6 }
 0x942   : > { %2652 = vtanh.f32 %v2065_v10 }
 0x943   : > { %2654 = vtanh.f32 %v2066_v46 }
 0x948   : > { %v2653_v14 = vpop.eup %2652 }
 0x949   : > { %v2655_v12 = vpop.eup %2654  ;;  %v2073_v18 = vadd.f32 1.0, %v2653_v14 }
 0x94a   : > { %v2074_v41 = vadd.f32 1.0, %v2655_v12 }
 0x94b   : > { %v2077_v22 = vmul.f32 %v2073_v18, %v2045_v19 }
 0x94c   : > { %v2078_v25 = vmul.f32 %v2074_v41, %v2046_v21 }
 0x94d   : > { %2134 = vmatmul.f32.gmra.mxu2 %v2077_v22 }
 0x94e   : > { %2157 = vmatmul.f32.gmra.mxu3 %v2078_v25 }
 0x9ad   : > { %v2132_v48 = vpop.f32.mrf.mxu2 }
 0x9ae   : > { %v2133_v26 = vadd.f32 %v2573_v37, %v2132_v48  ;;  %v2155_v27 = vpop.f32.mrf.mxu3 }
 0x9b0   : > { %v2156_v36 = vadd.f32 %v2155_v27, %v2133_v26 }
 0x9b2   : > { %v2161_v13 = vadd.f32 %v2156_v36, %v3678_v57 }
 0x9b4   : > { %2163 = vst [vmem:[%s557_s29] sm:$0xff] %v2161_v13 }
 0x9d0   : > { %v2135_v30 = vpop.f32.mrf.mxu2 }
 0x9d1   : > { %v2136_v43 = vadd.f32 %v2573_v37, %v2135_v30  ;;  %v2158_v34 = vpop.f32.mrf.mxu3 }
 0x9d3   : > { %v2159_v35 = vadd.f32 %v2158_v34, %v2136_v43 }
 0x9d5   : > { %v2162_v4 = vadd.f32 %v2159_v35, %v3682_v40 }
 0x9d7   : > { %2164 = vst [vmem:[%s557_s29 + $0x8] sm:$0xff] %v2162_v4 }
 0x9d8   : > { %2895 = shalt.err (!%p2892_p9)
}
 0x9d9   : > { %s2969_s13 = smov 128   ;;  %s2970_s29 = smov 8  }
 0x9da   : > { %2415 = dma.vmem_to_hbm [thread:$0]  (%p3147_p5), %s2179_s11, 256, %s2181_s21, %s2166_s3, %s2969_s13, %s2969_s13, %s2970_s29  }
 0x9db PF: > { %s2195_s14 = sand.u32 1, %s2934_s25   ;;  %p3800_p10 = scmp.ge.s32.totalorder %s2946_s28, 2 }
 0x9dc   : > { %s2196_s24 = scalar_lea.sflag [#allocation4], %s2195_s14 }
 0x9dd   : > { %p2441_p13 = pnand %p3800_p10, %p3151_p6 }
 0x9df   : > { %p2442_p11 = pneg %p2441_p13 }
 0x9e1   : > { %2929 = dma.done.wait (%p2442_p11), %s2196_s24, 256  }
 0x9e2   : > { %2931 = vsyncadd (%p2442_p11), %s2196_s24, 4294967040  ;;  %p29_p0 = scmp.ge.s32.totalorder %s3121_s19, 4   ;;  %s3801_s25 = smov %s2938_s26 }
 0x9e3   : > { %s3802_s26 = smov %s2942_s27  ;;  %s3803_s27 = smov %s3132_s23 }
 0x9e4   : > { %s3804_s28 = smov %s3121_s19  ;;  %31 = sbr.rel (!%p29_p0) target bundleno = 17 (0x11), region = 148 }
 0x9e9   :  { %2202 = vsyncpa [#allocation3], 1 }
 0x9ea   :  { %2204 = vsyncpa [#allocation3 + $0x1], 1 }
 0x9eb   :  { %2205 = vsyncpa [#allocation6], 1 }
 0x9ec   :  { %2206 = vsyncpa [#allocation9], 1 }
 0x9ed   :  { %2207 = vsyncpa [#allocation12], 1 }
 0x9ee   :  { %2208 = vsyncpa [#allocation4], 1 }
 0x9ef   :  { %2210 = vsyncpa [#allocation4 + $0x1], 1 }

</bundles_post_ra>
